<compile_context>
chip_gen: v5e
topology: v5e:2x2
jax: 0.10.0
libtpu: 0.0.40
codegen_flags: <defaults>
</compile_context>

<pallas_src>
import jax
import jax.numpy as jnp
from jax import lax
from jax.experimental import pallas as pl
from jax.experimental.pallas import tpu as pltpu

# ---- model sizes (small, consistent with the module's forward) ----
H = 32           # opt.hidden_dim (== embedding dim == LSTM input size)
H2 = 2 * H       # bidirectional output width
ATT = 24         # attention MLP hidden size (nn.Linear(2H, 24))
S = 8            # sequence length
L = 4            # opt.lebel_dim
VOCAB = 20       # embedding rows

B_TILE = 8       # sequences per grid step (8 sublanes -> aligned per-step slices)

# packed gate layout: [i | f | o | g], each gate group padded to a 128-lane block,
# active lanes 0:2H column-interleaved [fwd(0:H) | bwd(H:2H)]
GATE_BLK = 128
GW = 4 * GATE_BLK          # 512
SIG_W = 3 * GATE_BLK       # sigmoid gates (i, f, o)

A_ROWS = 2 * VOCAB + H2    # 104  (folded embed rows + block-diag Whh rows)

# w_buf row offsets (all 8-row aligned), width 128 (lane-dense)
W_COLS = 128
_W1_R = 0                   # rows 0:64    W1   (2H x ATT in cols 0:ATT)
_B1_R = _W1_R + H2          # row  64      b1
_W2_R = _B1_R + 8           # rows 72:200  w2 as a (128, 1) column (col 0)
_WC_R = _W2_R + W_COLS      # rows 200:264 Wc   (2H x L in cols 0:L)
_BC_R = _WC_R + H2          # row  264     bc
_W_ROWS = _BC_R + 8         # 272


def attn_classifier_kernel(ids_ref, a_ref, w_ref, out_ref):
    # ids_ref : (1, S*B_TILE, 2) int32  col0 = fwd token id, col1 = bwd id + VOCAB
    # a_ref   : (A_ROWS, GW) f32  rows 0:2V = embed x Wih (+bias), rows 2V: = Whh
    # w_ref   : (_W_ROWS, W_COLS) f32  packed attention + classifier weights
    # out_ref : (B_TILE, W_COLS) f32   lane-dense; cols 0:L hold the logits

    # ---- folded embedding gather + input projection (both directions) ----
    ids = ids_ref[0]                                               # (S*B_TILE, 2)
    iota = lax.broadcasted_iota(jnp.int32, (S * B_TILE, 2 * VOCAB), 1)
    onehot = ((iota == ids[:, 0:1]).astype(jnp.float32)
              + (iota == ids[:, 1:2]).astype(jnp.float32))         # (S*B_TILE, 2V)
    p = a_ref[0:2 * VOCAB, :]                                      # (2V, GW)
    whh = a_ref[2 * VOCAB:2 * VOCAB + H2, :]                       # (2H, GW)
    gx = jnp.dot(onehot, p, preferred_element_type=jnp.float32)    # (S*B_TILE, GW)

    # ---- fused bidirectional LSTM recurrence (unrolled, S=8) ----
    h = jnp.zeros((B_TILE, H2), jnp.float32)    # [h_fwd | h_bwd]
    c = jnp.zeros((B_TILE, H2), jnp.float32)
    h_list = []
    for t in range(S):                                             # static unroll
        gates = gx[t * B_TILE:(t + 1) * B_TILE, :] + jnp.dot(
            h, whh, preferred_element_type=jnp.float32)            # (B_TILE, GW)
        # sigmoid via tanh: one EUP push per vreg, only over the i/f/o blocks
        sg = 0.5 * (jnp.tanh(0.5 * gates[:, 0:SIG_W]) + 1.0)
        i_g = sg[:, 0:H2]                                          # lanes 0:64 of blk 0
        f_g = sg[:, GATE_BLK:GATE_BLK + H2]                        # lanes 0:64 of blk 1
        o_g = sg[:, 2 * GATE_BLK:2 * GATE_BLK + H2]                # lanes 0:64 of blk 2
        g_g = jnp.tanh(gates[:, 3 * GATE_BLK:3 * GATE_BLK + H2])   # lanes 0:64 of blk 3
        c = f_g * c + i_g * g_g
        h = o_g * jnp.tanh(c)
        h_list.append(h)

    # time-aligned bidirectional output [h_f(t) | h_b(t)] via a lane select
    # (both operands already at the right lane offsets -> no rotate, no concat)
    lane = lax.broadcasted_iota(jnp.int32, (B_TILE, H2), 1)
    fwd_mask = lane < H
    hcat3 = jnp.stack(
        [jnp.where(fwd_mask, h_list[t], h_list[S - 1 - t]) for t in range(S)],
        axis=0)                                                    # (S, B_TILE, 2H)
    hcat = hcat3.reshape(S * B_TILE, H2)                           # (S*B_TILE, 2H)

    # ---- attention MLP: Linear(2H,24) -> ReLU -> Linear(24,1) (b2 dropped) ----
    w1 = w_ref[_W1_R:_W1_R + H2, :]                  # (2H, 128), cols 0:ATT active
    b1 = w_ref[_B1_R:_B1_R + 1, :]                   # (1, 128)
    w2c = w_ref[_W2_R:_W2_R + W_COLS, 0:1]           # (128, 1)
    a1 = jnp.maximum(
        jnp.dot(hcat, w1, preferred_element_type=jnp.float32) + b1, 0.0)
    e = jnp.dot(a1, w2c, preferred_element_type=jnp.float32)      # (S*B_TILE, 1)
    e3 = e.reshape(S, B_TILE, 1)                                   # layout-preserving

    # ---- softmax over the sequence axis (PyTorch dim=1) ----
    m = jnp.max(e3, axis=0, keepdims=True)
    pe = jnp.exp(e3 - m)
    attn3 = pe / jnp.sum(pe, axis=0, keepdims=True)                # (S, B_TILE, 1)

    # ---- weighted sum over time ----
    feats = jnp.sum(hcat3 * attn3, axis=0)                         # (B_TILE, 2H)

    # ---- classifier (lane-dense output: cols L:128 are exactly 0) ----
    wc = w_ref[_WC_R:_WC_R + H2, :]                  # (2H, 128), cols 0:L active
    bc = w_ref[_BC_R:_BC_R + 1, :]                   # (1, 128)
    out_ref[...] = jnp.dot(feats, wc, preferred_element_type=jnp.float32) + bc


# ---------------- parameter construction / packing ----------------

def build_params(key):
    ks = jax.random.split(key, 15)

    def u(k, shape, scale=0.1):
        return jax.random.uniform(k, shape, jnp.float32, -scale, scale)

    return dict(
        embedding=u(ks[0], (VOCAB, H)),
        # PyTorch LSTM parameter shapes: weight_ih (4H, in), weight_hh (4H, H)
        wih_f=u(ks[1], (4 * H, H)), whh_f=u(ks[2], (4 * H, H)),
        bih_f=u(ks[3], (4 * H,)),   bhh_f=u(ks[4], (4 * H,)),
        wih_b=u(ks[5], (4 * H, H)), whh_b=u(ks[6], (4 * H, H)),
        bih_b=u(ks[7], (4 * H,)),   bhh_b=u(ks[8], (4 * H,)),
        # Attn.cr_att: Linear(2H,24), Linear(24,1)
        w1=u(ks[9], (ATT, H2)),  b1=u(ks[10], (ATT,)),
        w2=u(ks[11], (1, ATT)),  b2=u(ks[12], (1,)),
        # cr: Linear(2H, L)
        wc=u(ks[13], (L, H2)),   bc=u(ks[14], (L,)),
    )


def _pack_gates(mat_f, mat_b):
    """(K, 4H) per-direction matrices (PyTorch gate order i,f,g,o along columns)
    -> (K, GW) with gate blocks [i | f | o | g], each padded to 128 lanes and
    column-interleaved [fwd(0:H) | bwd(H:2H)]."""
    k = mat_f.shape[0]
    out = jnp.zeros((k, GW), jnp.float32)
    for torch_g, blk in ((0, 0), (1, 1), (2, 3), (3, 2)):   # i,f,g,o -> i,f,o,g
        out = out.at[:, blk * GATE_BLK:blk * GATE_BLK + H].set(
            mat_f[:, torch_g * H:(torch_g + 1) * H])
        out = out.at[:, blk * GATE_BLK + H:blk * GATE_BLK + H2].set(
            mat_b[:, torch_g * H:(torch_g + 1) * H])
    return out


def prepare_params(params):
    """One-time packing: fold the embedding into the input projections, build a
    block-diag Whh in the padded gate layout, pack the attention/classifier
    weights into one lane-dense buffer."""
    px_f = params["embedding"] @ params["wih_f"].T          # (VOCAB, 4H)
    px_b = params["embedding"] @ params["wih_b"].T
    bias = _pack_gates((params["bih_f"] + params["bhh_f"])[None, :],
                       (params["bih_b"] + params["bhh_b"])[None, :])   # (1, GW)
    zv = jnp.zeros_like(px_f)
    p_top = _pack_gates(px_f, zv) + bias                    # fwd one-hot rows (+ biases)
    p_bot = _pack_gates(zv, px_b)                           # bwd one-hot rows
    zh = jnp.zeros((H, 4 * H), jnp.float32)
    whh_blk = jnp.concatenate(
        [_pack_gates(params["whh_f"].T, zh),                # h_f rows -> fwd columns
         _pack_gates(zh, params["whh_b"].T)], axis=0)       # h_b rows -> bwd columns
    a_buf = jnp.concatenate([p_top, p_bot, whh_blk], axis=0)
    assert a_buf.shape == (A_ROWS, GW)

    w_buf = jnp.zeros((_W_ROWS, W_COLS), jnp.float32)
    w_buf = w_buf.at[_W1_R:_W1_R + H2, :ATT].set(params["w1"].T)
    w_buf = w_buf.at[_B1_R, :ATT].set(params["b1"])
    # b2 dropped: softmax is shift invariant
    w_buf = w_buf.at[_W2_R:_W2_R + ATT, 0].set(params["w2"][0])
    w_buf = w_buf.at[_WC_R:_WC_R + H2, :L].set(params["wc"].T)
    w_buf = w_buf.at[_BC_R, :L].set(params["bc"])
    return dict(a=a_buf, w=w_buf)


@jax.jit
def attn_classifier_forward(prepped, token_ids):
    batch, seq = token_ids.shape
    assert seq == S
    num_tiles = (batch + B_TILE - 1) // B_TILE
    pad = num_tiles * B_TILE - batch
    tok = jnp.pad(token_ids.astype(jnp.int32), ((0, pad), (0, 0)))  # dummy rows: token 0
    tok = tok.reshape(num_tiles, B_TILE, S)
    tok_tm = jnp.transpose(tok, (0, 2, 1))                          # (T, S, B_TILE)
    # ids2[tile, t*B_TILE+b] = [token[b, t], token[b, S-1-t] + VOCAB]
    ids2 = jnp.stack([tok_tm, tok_tm[:, ::-1, :] + VOCAB], axis=-1)
    ids2 = ids2.reshape(num_tiles, S * B_TILE, 2)

    out = pl.pallas_call(
        attn_classifier_kernel,
        out_shape=jax.ShapeDtypeStruct((num_tiles * B_TILE, W_COLS), jnp.float32),
        grid=(num_tiles,),
        in_specs=[
            pl.BlockSpec((1, S * B_TILE, 2), lambda i: (i, 0, 0)),   # per-tile ids
            pl.BlockSpec((A_ROWS, GW), lambda i: (0, 0)),            # resident weights
            pl.BlockSpec((_W_ROWS, W_COLS), lambda i: (0, 0)),       # resident weights
        ],
        out_specs=pl.BlockSpec((B_TILE, W_COLS), lambda i: (i, 0)),  # lane-dense output
        compiler_params=pltpu.CompilerParams(
            dimension_semantics=("parallel",)),
    )(ids2, prepped["a"], prepped["w"])
    return out[:batch, :L]


# ---------------- pure-JAX reference (validation) ----------------

def reference_forward(params, token_ids):
    bsz = token_ids.shape[0]
    emb = params["embedding"][token_ids]          # (bsz, S, H)
    xs = jnp.transpose(emb, (1, 0, 2))            # (S, bsz, H)

    def run_dir(wih, whh, bih, bhh, xseq):
        def step(carry, x):
            h, c = carry
            g = x @ wih.T + bih + h @ whh.T + bhh
            i = jax.nn.sigmoid(g[:, 0 * H:1 * H])
            f = jax.nn.sigmoid(g[:, 1 * H:2 * H])
            gg = jnp.tanh(g[:, 2 * H:3 * H])
            o = jax.nn.sigmoid(g[:, 3 * H:4 * H])
            c = f * c + i * gg
            h = o * jnp.tanh(c)
            return (h, c), h
        init = (jnp.zeros((bsz, H)), jnp.zeros((bsz, H)))
        _, hs = lax.scan(step, init, xseq)
        return hs                                  # (S, bsz, H)

    hf = run_dir(params["wih_f"], params["whh_f"], params["bih_f"], params["bhh_f"], xs)
    hb = run_dir(params["wih_b"], params["whh_b"], params["bih_b"], params["bhh_b"], xs[::-1])[::-1]
    out = jnp.transpose(jnp.concatenate([hf, hb], axis=-1), (1, 0, 2))   # (bsz, S, 2H)

    e = jnp.maximum(out @ params["w1"].T + params["b1"], 0.0) @ params["w2"].T + params["b2"]
    attn = jax.nn.softmax(e[..., 0], axis=1)[..., None]                  # (bsz, S, 1)
    feats = (out * attn).sum(axis=1)                                     # (bsz, 2H)
    return feats @ params["wc"].T + params["bc"]                         # (bsz, L)


if __name__ == "__main__":
    key = jax.random.PRNGKey(0)
    pkey, ikey, ikey2 = jax.random.split(key, 3)
    params = build_params(pkey)
    prepped = prepare_params(params)              # one-time weight packing

    # batch=2 (the module's small-shape spec) -> one grid tile
    token_ids = jax.random.randint(ikey, (2, S), 0, VOCAB, dtype=jnp.int32)
    out = jax.block_until_ready(attn_classifier_forward(prepped, token_ids))
    ref = reference_forward(params, token_ids)
    assert out.shape == (2, L), out.shape
    assert jnp.allclose(out, ref, atol=1e-3, rtol=1e-3), (out, ref)

    # larger batch -> multiple grid tiles (resident weights, parallel grid axis)
    token_ids_big = jax.random.randint(ikey2, (10, S), 0, VOCAB, dtype=jnp.int32)
    out_big = jax.block_until_ready(attn_classifier_forward(prepped, token_ids_big))
    ref_big = reference_forward(params, token_ids_big)
    assert jnp.allclose(out_big, ref_big, atol=1e-3, rtol=1e-3), (out_big, ref_big)

    print("KERNEL_OK")
</pallas_src>

<mosaic_0001>
module attributes {stable_mosaic.version = 11 : i64} {
  func.func @attn_classifier_kernel(%arg0: i32, %arg1: memref<1x64x2xi32, #tpu.memory_space<vmem>>, %arg2: memref<104x512xf32, #tpu.memory_space<vmem>>, %arg3: memref<272x128xf32, #tpu.memory_space<vmem>>, %arg4: memref<8x128xf32, #tpu.memory_space<vmem>>) attributes {dimension_semantics = [#tpu.dimension_semantics<parallel>], iteration_bounds = array<i64: 1>, scalar_prefetch = 0 : i64, scratch_operands = 0 : i64, tpu.core_type = #tpu.core_type<tc>, window_params = [{transform_indices = @transform_0, window_bounds = array<i64: 1, 64, 2>}, {pipeline_mode = #tpu.pipeline_mode<synchronous>, transform_indices = @transform_1, window_bounds = array<i64: 104, 512>}, {pipeline_mode = #tpu.pipeline_mode<synchronous>, transform_indices = @transform_2, window_bounds = array<i64: 272, 128>}, {transform_indices = @transform_3, window_bounds = array<i64: 8, 128>}]} {
    %c0 = arith.constant 0 : index
    %c0_0 = arith.constant 0 : index
    %c0_1 = arith.constant 0 : index
    %0 = vector.load %arg1[%c0, %c0_0, %c0_1] : memref<1x64x2xi32, #tpu.memory_space<vmem>>, vector<1x64x2xi32>
    %1 = vector.shape_cast %0 : vector<1x64x2xi32> to vector<64x2xi32>
    %2 = tpu.iota {dimensions = array<i32: 1>} : vector<64x40xi32>
    %3 = vector.extract_strided_slice %1 {offsets = [0, 0], sizes = [64, 1], strides = [1, 1]} : vector<64x2xi32> to vector<64x1xi32>
    %4 = vector.broadcast %3 : vector<64x1xi32> to vector<64x40xi32>
    %5 = arith.cmpi eq, %2, %4 : vector<64x40xi32>
    %6 = arith.extui %5 : vector<64x40xi1> to vector<64x40xi32>
    %7 = arith.sitofp %6 : vector<64x40xi32> to vector<64x40xf32>
    %8 = vector.extract_strided_slice %1 {offsets = [0, 1], sizes = [64, 1], strides = [1, 1]} : vector<64x2xi32> to vector<64x1xi32>
    %9 = vector.broadcast %8 : vector<64x1xi32> to vector<64x40xi32>
    %10 = arith.cmpi eq, %2, %9 : vector<64x40xi32>
    %11 = arith.extui %10 : vector<64x40xi1> to vector<64x40xi32>
    %12 = arith.sitofp %11 : vector<64x40xi32> to vector<64x40xf32>
    %13 = arith.addf %7, %12 : vector<64x40xf32>
    %c0_2 = arith.constant 0 : index
    %c0_3 = arith.constant 0 : index
    %14 = vector.load %arg2[%c0_2, %c0_3] : memref<104x512xf32, #tpu.memory_space<vmem>>, vector<40x512xf32>
    %c40 = arith.constant 40 : index
    %c0_4 = arith.constant 0 : index
    %15 = vector.load %arg2[%c40, %c0_4] : memref<104x512xf32, #tpu.memory_space<vmem>>, vector<64x512xf32>
    %cst = arith.constant dense<0.000000e+00> : vector<64x512xf32>
    %16 = tpu.matmul %13, %14, %cst {dimension_numbers = #tpu.dot_dimension_numbers<[1], [0], [0], [1], [0, 0, 1, 1], [], []>} : vector<64x40xf32>, vector<40x512xf32>, vector<64x512xf32> -> vector<64x512xf32>
    %cst_5 = arith.constant 0.000000e+00 : f32
    %17 = vector.broadcast %cst_5 : f32 to vector<8x64xf32>
    %cst_6 = arith.constant 0.000000e+00 : f32
    %18 = vector.broadcast %cst_6 : f32 to vector<8x64xf32>
    %19 = vector.extract_strided_slice %16 {offsets = [0, 0], sizes = [8, 512], strides = [1, 1]} : vector<64x512xf32> to vector<8x512xf32>
    %cst_7 = arith.constant dense<0.000000e+00> : vector<8x512xf32>
    %20 = tpu.matmul %17, %15, %cst_7 {dimension_numbers = #tpu.dot_dimension_numbers<[1], [0], [0], [1], [0, 0, 1, 1], [], []>} : vector<8x64xf32>, vector<64x512xf32>, vector<8x512xf32> -> vector<8x512xf32>
    %21 = arith.addf %19, %20 : vector<8x512xf32>
    %22 = vector.extract_strided_slice %21 {offsets = [0, 0], sizes = [8, 384], strides = [1, 1]} : vector<8x512xf32> to vector<8x384xf32>
    %cst_8 = arith.constant 5.000000e-01 : f32
    %23 = vector.broadcast %cst_8 : f32 to vector<8x384xf32>
    %24 = arith.mulf %23, %22 : vector<8x384xf32>
    %25 = math.tanh %24 : vector<8x384xf32>
    %cst_9 = arith.constant 1.000000e+00 : f32
    %26 = vector.broadcast %cst_9 : f32 to vector<8x384xf32>
    %27 = arith.addf %25, %26 : vector<8x384xf32>
    %cst_10 = arith.constant 5.000000e-01 : f32
    %28 = vector.broadcast %cst_10 : f32 to vector<8x384xf32>
    %29 = arith.mulf %28, %27 : vector<8x384xf32>
    %30 = vector.extract_strided_slice %29 {offsets = [0, 0], sizes = [8, 64], strides = [1, 1]} : vector<8x384xf32> to vector<8x64xf32>
    %31 = vector.extract_strided_slice %29 {offsets = [0, 128], sizes = [8, 64], strides = [1, 1]} : vector<8x384xf32> to vector<8x64xf32>
    %32 = vector.extract_strided_slice %29 {offsets = [0, 256], sizes = [8, 64], strides = [1, 1]} : vector<8x384xf32> to vector<8x64xf32>
    %33 = vector.extract_strided_slice %21 {offsets = [0, 384], sizes = [8, 64], strides = [1, 1]} : vector<8x512xf32> to vector<8x64xf32>
    %34 = math.tanh %33 : vector<8x64xf32>
    %35 = arith.mulf %31, %18 : vector<8x64xf32>
    %36 = arith.mulf %30, %34 : vector<8x64xf32>
    %37 = arith.addf %35, %36 : vector<8x64xf32>
    %38 = math.tanh %37 : vector<8x64xf32>
    %39 = arith.mulf %32, %38 : vector<8x64xf32>
    %40 = vector.extract_strided_slice %16 {offsets = [8, 0], sizes = [8, 512], strides = [1, 1]} : vector<64x512xf32> to vector<8x512xf32>
    %cst_11 = arith.constant dense<0.000000e+00> : vector<8x512xf32>
    %41 = tpu.matmul %39, %15, %cst_11 {dimension_numbers = #tpu.dot_dimension_numbers<[1], [0], [0], [1], [0, 0, 1, 1], [], []>} : vector<8x64xf32>, vector<64x512xf32>, vector<8x512xf32> -> vector<8x512xf32>
    %42 = arith.addf %40, %41 : vector<8x512xf32>
    %43 = vector.extract_strided_slice %42 {offsets = [0, 0], sizes = [8, 384], strides = [1, 1]} : vector<8x512xf32> to vector<8x384xf32>
    %cst_12 = arith.constant 5.000000e-01 : f32
    %44 = vector.broadcast %cst_12 : f32 to vector<8x384xf32>
    %45 = arith.mulf %44, %43 : vector<8x384xf32>
    %46 = math.tanh %45 : vector<8x384xf32>
    %cst_13 = arith.constant 1.000000e+00 : f32
    %47 = vector.broadcast %cst_13 : f32 to vector<8x384xf32>
    %48 = arith.addf %46, %47 : vector<8x384xf32>
    %cst_14 = arith.constant 5.000000e-01 : f32
    %49 = vector.broadcast %cst_14 : f32 to vector<8x384xf32>
    %50 = arith.mulf %49, %48 : vector<8x384xf32>
    %51 = vector.extract_strided_slice %50 {offsets = [0, 0], sizes = [8, 64], strides = [1, 1]} : vector<8x384xf32> to vector<8x64xf32>
    %52 = vector.extract_strided_slice %50 {offsets = [0, 128], sizes = [8, 64], strides = [1, 1]} : vector<8x384xf32> to vector<8x64xf32>
    %53 = vector.extract_strided_slice %50 {offsets = [0, 256], sizes = [8, 64], strides = [1, 1]} : vector<8x384xf32> to vector<8x64xf32>
    %54 = vector.extract_strided_slice %42 {offsets = [0, 384], sizes = [8, 64], strides = [1, 1]} : vector<8x512xf32> to vector<8x64xf32>
    %55 = math.tanh %54 : vector<8x64xf32>
    %56 = arith.mulf %52, %37 : vector<8x64xf32>
    %57 = arith.mulf %51, %55 : vector<8x64xf32>
    %58 = arith.addf %56, %57 : vector<8x64xf32>
    %59 = math.tanh %58 : vector<8x64xf32>
    %60 = arith.mulf %53, %59 : vector<8x64xf32>
    %61 = vector.extract_strided_slice %16 {offsets = [16, 0], sizes = [8, 512], strides = [1, 1]} : vector<64x512xf32> to vector<8x512xf32>
    %cst_15 = arith.constant dense<0.000000e+00> : vector<8x512xf32>
    %62 = tpu.matmul %60, %15, %cst_15 {dimension_numbers = #tpu.dot_dimension_numbers<[1], [0], [0], [1], [0, 0, 1, 1], [], []>} : vector<8x64xf32>, vector<64x512xf32>, vector<8x512xf32> -> vector<8x512xf32>
    %63 = arith.addf %61, %62 : vector<8x512xf32>
    %64 = vector.extract_strided_slice %63 {offsets = [0, 0], sizes = [8, 384], strides = [1, 1]} : vector<8x512xf32> to vector<8x384xf32>
    %cst_16 = arith.constant 5.000000e-01 : f32
    %65 = vector.broadcast %cst_16 : f32 to vector<8x384xf32>
    %66 = arith.mulf %65, %64 : vector<8x384xf32>
    %67 = math.tanh %66 : vector<8x384xf32>
    %cst_17 = arith.constant 1.000000e+00 : f32
    %68 = vector.broadcast %cst_17 : f32 to vector<8x384xf32>
    %69 = arith.addf %67, %68 : vector<8x384xf32>
    %cst_18 = arith.constant 5.000000e-01 : f32
    %70 = vector.broadcast %cst_18 : f32 to vector<8x384xf32>
    %71 = arith.mulf %70, %69 : vector<8x384xf32>
    %72 = vector.extract_strided_slice %71 {offsets = [0, 0], sizes = [8, 64], strides = [1, 1]} : vector<8x384xf32> to vector<8x64xf32>
    %73 = vector.extract_strided_slice %71 {offsets = [0, 128], sizes = [8, 64], strides = [1, 1]} : vector<8x384xf32> to vector<8x64xf32>
    %74 = vector.extract_strided_slice %71 {offsets = [0, 256], sizes = [8, 64], strides = [1, 1]} : vector<8x384xf32> to vector<8x64xf32>
    %75 = vector.extract_strided_slice %63 {offsets = [0, 384], sizes = [8, 64], strides = [1, 1]} : vector<8x512xf32> to vector<8x64xf32>
    %76 = math.tanh %75 : vector<8x64xf32>
    %77 = arith.mulf %73, %58 : vector<8x64xf32>
    %78 = arith.mulf %72, %76 : vector<8x64xf32>
    %79 = arith.addf %77, %78 : vector<8x64xf32>
    %80 = math.tanh %79 : vector<8x64xf32>
    %81 = arith.mulf %74, %80 : vector<8x64xf32>
    %82 = vector.extract_strided_slice %16 {offsets = [24, 0], sizes = [8, 512], strides = [1, 1]} : vector<64x512xf32> to vector<8x512xf32>
    %cst_19 = arith.constant dense<0.000000e+00> : vector<8x512xf32>
    %83 = tpu.matmul %81, %15, %cst_19 {dimension_numbers = #tpu.dot_dimension_numbers<[1], [0], [0], [1], [0, 0, 1, 1], [], []>} : vector<8x64xf32>, vector<64x512xf32>, vector<8x512xf32> -> vector<8x512xf32>
    %84 = arith.addf %82, %83 : vector<8x512xf32>
    %85 = vector.extract_strided_slice %84 {offsets = [0, 0], sizes = [8, 384], strides = [1, 1]} : vector<8x512xf32> to vector<8x384xf32>
    %cst_20 = arith.constant 5.000000e-01 : f32
    %86 = vector.broadcast %cst_20 : f32 to vector<8x384xf32>
    %87 = arith.mulf %86, %85 : vector<8x384xf32>
    %88 = math.tanh %87 : vector<8x384xf32>
    %cst_21 = arith.constant 1.000000e+00 : f32
    %89 = vector.broadcast %cst_21 : f32 to vector<8x384xf32>
    %90 = arith.addf %88, %89 : vector<8x384xf32>
    %cst_22 = arith.constant 5.000000e-01 : f32
    %91 = vector.broadcast %cst_22 : f32 to vector<8x384xf32>
    %92 = arith.mulf %91, %90 : vector<8x384xf32>
    %93 = vector.extract_strided_slice %92 {offsets = [0, 0], sizes = [8, 64], strides = [1, 1]} : vector<8x384xf32> to vector<8x64xf32>
    %94 = vector.extract_strided_slice %92 {offsets = [0, 128], sizes = [8, 64], strides = [1, 1]} : vector<8x384xf32> to vector<8x64xf32>
    %95 = vector.extract_strided_slice %92 {offsets = [0, 256], sizes = [8, 64], strides = [1, 1]} : vector<8x384xf32> to vector<8x64xf32>
    %96 = vector.extract_strided_slice %84 {offsets = [0, 384], sizes = [8, 64], strides = [1, 1]} : vector<8x512xf32> to vector<8x64xf32>
    %97 = math.tanh %96 : vector<8x64xf32>
    %98 = arith.mulf %94, %79 : vector<8x64xf32>
    %99 = arith.mulf %93, %97 : vector<8x64xf32>
    %100 = arith.addf %98, %99 : vector<8x64xf32>
    %101 = math.tanh %100 : vector<8x64xf32>
    %102 = arith.mulf %95, %101 : vector<8x64xf32>
    %103 = vector.extract_strided_slice %16 {offsets = [32, 0], sizes = [8, 512], strides = [1, 1]} : vector<64x512xf32> to vector<8x512xf32>
    %cst_23 = arith.constant dense<0.000000e+00> : vector<8x512xf32>
    %104 = tpu.matmul %102, %15, %cst_23 {dimension_numbers = #tpu.dot_dimension_numbers<[1], [0], [0], [1], [0, 0, 1, 1], [], []>} : vector<8x64xf32>, vector<64x512xf32>, vector<8x512xf32> -> vector<8x512xf32>
    %105 = arith.addf %103, %104 : vector<8x512xf32>
    %106 = vector.extract_strided_slice %105 {offsets = [0, 0], sizes = [8, 384], strides = [1, 1]} : vector<8x512xf32> to vector<8x384xf32>
    %cst_24 = arith.constant 5.000000e-01 : f32
    %107 = vector.broadcast %cst_24 : f32 to vector<8x384xf32>
    %108 = arith.mulf %107, %106 : vector<8x384xf32>
    %109 = math.tanh %108 : vector<8x384xf32>
    %cst_25 = arith.constant 1.000000e+00 : f32
    %110 = vector.broadcast %cst_25 : f32 to vector<8x384xf32>
    %111 = arith.addf %109, %110 : vector<8x384xf32>
    %cst_26 = arith.constant 5.000000e-01 : f32
    %112 = vector.broadcast %cst_26 : f32 to vector<8x384xf32>
    %113 = arith.mulf %112, %111 : vector<8x384xf32>
    %114 = vector.extract_strided_slice %113 {offsets = [0, 0], sizes = [8, 64], strides = [1, 1]} : vector<8x384xf32> to vector<8x64xf32>
    %115 = vector.extract_strided_slice %113 {offsets = [0, 128], sizes = [8, 64], strides = [1, 1]} : vector<8x384xf32> to vector<8x64xf32>
    %116 = vector.extract_strided_slice %113 {offsets = [0, 256], sizes = [8, 64], strides = [1, 1]} : vector<8x384xf32> to vector<8x64xf32>
    %117 = vector.extract_strided_slice %105 {offsets = [0, 384], sizes = [8, 64], strides = [1, 1]} : vector<8x512xf32> to vector<8x64xf32>
    %118 = math.tanh %117 : vector<8x64xf32>
    %119 = arith.mulf %115, %100 : vector<8x64xf32>
    %120 = arith.mulf %114, %118 : vector<8x64xf32>
    %121 = arith.addf %119, %120 : vector<8x64xf32>
    %122 = math.tanh %121 : vector<8x64xf32>
    %123 = arith.mulf %116, %122 : vector<8x64xf32>
    %124 = vector.extract_strided_slice %16 {offsets = [40, 0], sizes = [8, 512], strides = [1, 1]} : vector<64x512xf32> to vector<8x512xf32>
    %cst_27 = arith.constant dense<0.000000e+00> : vector<8x512xf32>
    %125 = tpu.matmul %123, %15, %cst_27 {dimension_numbers = #tpu.dot_dimension_numbers<[1], [0], [0], [1], [0, 0, 1, 1], [], []>} : vector<8x64xf32>, vector<64x512xf32>, vector<8x512xf32> -> vector<8x512xf32>
    %126 = arith.addf %124, %125 : vector<8x512xf32>
    %127 = vector.extract_strided_slice %126 {offsets = [0, 0], sizes = [8, 384], strides = [1, 1]} : vector<8x512xf32> to vector<8x384xf32>
    %cst_28 = arith.constant 5.000000e-01 : f32
    %128 = vector.broadcast %cst_28 : f32 to vector<8x384xf32>
    %129 = arith.mulf %128, %127 : vector<8x384xf32>
    %130 = math.tanh %129 : vector<8x384xf32>
    %cst_29 = arith.constant 1.000000e+00 : f32
    %131 = vector.broadcast %cst_29 : f32 to vector<8x384xf32>
    %132 = arith.addf %130, %131 : vector<8x384xf32>
    %cst_30 = arith.constant 5.000000e-01 : f32
    %133 = vector.broadcast %cst_30 : f32 to vector<8x384xf32>
    %134 = arith.mulf %133, %132 : vector<8x384xf32>
    %135 = vector.extract_strided_slice %134 {offsets = [0, 0], sizes = [8, 64], strides = [1, 1]} : vector<8x384xf32> to vector<8x64xf32>
    %136 = vector.extract_strided_slice %134 {offsets = [0, 128], sizes = [8, 64], strides = [1, 1]} : vector<8x384xf32> to vector<8x64xf32>
    %137 = vector.extract_strided_slice %134 {offsets = [0, 256], sizes = [8, 64], strides = [1, 1]} : vector<8x384xf32> to vector<8x64xf32>
    %138 = vector.extract_strided_slice %126 {offsets = [0, 384], sizes = [8, 64], strides = [1, 1]} : vector<8x512xf32> to vector<8x64xf32>
    %139 = math.tanh %138 : vector<8x64xf32>
    %140 = arith.mulf %136, %121 : vector<8x64xf32>
    %141 = arith.mulf %135, %139 : vector<8x64xf32>
    %142 = arith.addf %140, %141 : vector<8x64xf32>
    %143 = math.tanh %142 : vector<8x64xf32>
    %144 = arith.mulf %137, %143 : vector<8x64xf32>
    %145 = vector.extract_strided_slice %16 {offsets = [48, 0], sizes = [8, 512], strides = [1, 1]} : vector<64x512xf32> to vector<8x512xf32>
    %cst_31 = arith.constant dense<0.000000e+00> : vector<8x512xf32>
    %146 = tpu.matmul %144, %15, %cst_31 {dimension_numbers = #tpu.dot_dimension_numbers<[1], [0], [0], [1], [0, 0, 1, 1], [], []>} : vector<8x64xf32>, vector<64x512xf32>, vector<8x512xf32> -> vector<8x512xf32>
    %147 = arith.addf %145, %146 : vector<8x512xf32>
    %148 = vector.extract_strided_slice %147 {offsets = [0, 0], sizes = [8, 384], strides = [1, 1]} : vector<8x512xf32> to vector<8x384xf32>
    %cst_32 = arith.constant 5.000000e-01 : f32
    %149 = vector.broadcast %cst_32 : f32 to vector<8x384xf32>
    %150 = arith.mulf %149, %148 : vector<8x384xf32>
    %151 = math.tanh %150 : vector<8x384xf32>
    %cst_33 = arith.constant 1.000000e+00 : f32
    %152 = vector.broadcast %cst_33 : f32 to vector<8x384xf32>
    %153 = arith.addf %151, %152 : vector<8x384xf32>
    %cst_34 = arith.constant 5.000000e-01 : f32
    %154 = vector.broadcast %cst_34 : f32 to vector<8x384xf32>
    %155 = arith.mulf %154, %153 : vector<8x384xf32>
    %156 = vector.extract_strided_slice %155 {offsets = [0, 0], sizes = [8, 64], strides = [1, 1]} : vector<8x384xf32> to vector<8x64xf32>
    %157 = vector.extract_strided_slice %155 {offsets = [0, 128], sizes = [8, 64], strides = [1, 1]} : vector<8x384xf32> to vector<8x64xf32>
    %158 = vector.extract_strided_slice %155 {offsets = [0, 256], sizes = [8, 64], strides = [1, 1]} : vector<8x384xf32> to vector<8x64xf32>
    %159 = vector.extract_strided_slice %147 {offsets = [0, 384], sizes = [8, 64], strides = [1, 1]} : vector<8x512xf32> to vector<8x64xf32>
    %160 = math.tanh %159 : vector<8x64xf32>
    %161 = arith.mulf %157, %142 : vector<8x64xf32>
    %162 = arith.mulf %156, %160 : vector<8x64xf32>
    %163 = arith.addf %161, %162 : vector<8x64xf32>
    %164 = math.tanh %163 : vector<8x64xf32>
    %165 = arith.mulf %158, %164 : vector<8x64xf32>
    %166 = vector.extract_strided_slice %16 {offsets = [56, 0], sizes = [8, 512], strides = [1, 1]} : vector<64x512xf32> to vector<8x512xf32>
    %cst_35 = arith.constant dense<0.000000e+00> : vector<8x512xf32>
    %167 = tpu.matmul %165, %15, %cst_35 {dimension_numbers = #tpu.dot_dimension_numbers<[1], [0], [0], [1], [0, 0, 1, 1], [], []>} : vector<8x64xf32>, vector<64x512xf32>, vector<8x512xf32> -> vector<8x512xf32>
    %168 = arith.addf %166, %167 : vector<8x512xf32>
    %169 = vector.extract_strided_slice %168 {offsets = [0, 0], sizes = [8, 384], strides = [1, 1]} : vector<8x512xf32> to vector<8x384xf32>
    %cst_36 = arith.constant 5.000000e-01 : f32
    %170 = vector.broadcast %cst_36 : f32 to vector<8x384xf32>
    %171 = arith.mulf %170, %169 : vector<8x384xf32>
    %172 = math.tanh %171 : vector<8x384xf32>
    %cst_37 = arith.constant 1.000000e+00 : f32
    %173 = vector.broadcast %cst_37 : f32 to vector<8x384xf32>
    %174 = arith.addf %172, %173 : vector<8x384xf32>
    %cst_38 = arith.constant 5.000000e-01 : f32
    %175 = vector.broadcast %cst_38 : f32 to vector<8x384xf32>
    %176 = arith.mulf %175, %174 : vector<8x384xf32>
    %177 = vector.extract_strided_slice %176 {offsets = [0, 0], sizes = [8, 64], strides = [1, 1]} : vector<8x384xf32> to vector<8x64xf32>
    %178 = vector.extract_strided_slice %176 {offsets = [0, 128], sizes = [8, 64], strides = [1, 1]} : vector<8x384xf32> to vector<8x64xf32>
    %179 = vector.extract_strided_slice %176 {offsets = [0, 256], sizes = [8, 64], strides = [1, 1]} : vector<8x384xf32> to vector<8x64xf32>
    %180 = vector.extract_strided_slice %168 {offsets = [0, 384], sizes = [8, 64], strides = [1, 1]} : vector<8x512xf32> to vector<8x64xf32>
    %181 = math.tanh %180 : vector<8x64xf32>
    %182 = arith.mulf %178, %163 : vector<8x64xf32>
    %183 = arith.mulf %177, %181 : vector<8x64xf32>
    %184 = arith.addf %182, %183 : vector<8x64xf32>
    %185 = math.tanh %184 : vector<8x64xf32>
    %186 = arith.mulf %179, %185 : vector<8x64xf32>
    %187 = tpu.iota {dimensions = array<i32: 1>} : vector<8x64xi32>
    %c32_i32 = arith.constant 32 : i32
    %188 = vector.broadcast %c32_i32 : i32 to vector<8x64xi32>
    %189 = arith.cmpi slt, %187, %188 : vector<8x64xi32>
    %190 = arith.select %189, %39, %186 : vector<8x64xi1>, vector<8x64xf32>
    %191 = arith.select %189, %60, %165 : vector<8x64xi1>, vector<8x64xf32>
    %192 = arith.select %189, %81, %144 : vector<8x64xi1>, vector<8x64xf32>
    %193 = arith.select %189, %102, %123 : vector<8x64xi1>, vector<8x64xf32>
    %194 = arith.select %189, %123, %102 : vector<8x64xi1>, vector<8x64xf32>
    %195 = arith.select %189, %144, %81 : vector<8x64xi1>, vector<8x64xf32>
    %196 = arith.select %189, %165, %60 : vector<8x64xi1>, vector<8x64xf32>
    %197 = arith.select %189, %186, %39 : vector<8x64xi1>, vector<8x64xf32>
    %198 = vector.shape_cast %190 : vector<8x64xf32> to vector<1x8x64xf32>
    %199 = vector.shape_cast %191 : vector<8x64xf32> to vector<1x8x64xf32>
    %200 = vector.shape_cast %192 : vector<8x64xf32> to vector<1x8x64xf32>
    %201 = vector.shape_cast %193 : vector<8x64xf32> to vector<1x8x64xf32>
    %202 = vector.shape_cast %194 : vector<8x64xf32> to vector<1x8x64xf32>
    %203 = vector.shape_cast %195 : vector<8x64xf32> to vector<1x8x64xf32>
    %204 = vector.shape_cast %196 : vector<8x64xf32> to vector<1x8x64xf32>
    %205 = vector.shape_cast %197 : vector<8x64xf32> to vector<1x8x64xf32>
    %206 = tpu.concatenate %198, %199, %200, %201, %202, %203, %204, %205 in 0 : vector<1x8x64xf32>, vector<1x8x64xf32>, vector<1x8x64xf32>, vector<1x8x64xf32>, vector<1x8x64xf32>, vector<1x8x64xf32>, vector<1x8x64xf32>, vector<1x8x64xf32> -> vector<8x8x64xf32>
    %207 = vector.shape_cast %206 : vector<8x8x64xf32> to vector<64x64xf32>
    %c0_39 = arith.constant 0 : index
    %c0_40 = arith.constant 0 : index
    %208 = vector.load %arg3[%c0_39, %c0_40] : memref<272x128xf32, #tpu.memory_space<vmem>>, vector<64x128xf32>
    %c64 = arith.constant 64 : index
    %c0_41 = arith.constant 0 : index
    %209 = vector.load %arg3[%c64, %c0_41] : memref<272x128xf32, #tpu.memory_space<vmem>>, vector<1x128xf32>
    %c72 = arith.constant 72 : index
    %c0_42 = arith.constant 0 : index
    %210 = vector.load %arg3[%c72, %c0_42] : memref<272x128xf32, #tpu.memory_space<vmem>>, vector<128x1xf32>
    %cst_43 = arith.constant dense<0.000000e+00> : vector<64x128xf32>
    %211 = tpu.matmul %207, %208, %cst_43 {dimension_numbers = #tpu.dot_dimension_numbers<[1], [0], [0], [1], [0, 0, 1, 1], [], []>} : vector<64x64xf32>, vector<64x128xf32>, vector<64x128xf32> -> vector<64x128xf32>
    %212 = vector.broadcast %209 : vector<1x128xf32> to vector<64x128xf32>
    %213 = arith.addf %211, %212 : vector<64x128xf32>
    %cst_44 = arith.constant 0.000000e+00 : f32
    %214 = vector.broadcast %cst_44 : f32 to vector<64x128xf32>
    %215 = arith.maximumf %213, %214 : vector<64x128xf32>
    %cst_45 = arith.constant dense<0.000000e+00> : vector<64x1xf32>
    %216 = tpu.matmul %215, %210, %cst_45 {dimension_numbers = #tpu.dot_dimension_numbers<[1], [0], [0], [1], [0, 0, 1, 1], [], []>} : vector<64x128xf32>, vector<128x1xf32>, vector<64x1xf32> -> vector<64x1xf32>
    %217 = vector.shape_cast %216 : vector<64x1xf32> to vector<8x8x1xf32>
    %cst_46 = arith.constant dense<0xFF800000> : vector<8x1xf32>
    %218 = vector.multi_reduction <maximumf>, %217, %cst_46 [0] : vector<8x8x1xf32> to vector<8x1xf32>
    %219 = vector.shape_cast %218 : vector<8x1xf32> to vector<1x8x1xf32>
    %220 = vector.broadcast %219 : vector<1x8x1xf32> to vector<8x8x1xf32>
    %221 = arith.subf %217, %220 : vector<8x8x1xf32>
    %222 = math.exp %221 : vector<8x8x1xf32>
    %cst_47 = arith.constant dense<0.000000e+00> : vector<8x1xf32>
    %223 = vector.multi_reduction <add>, %222, %cst_47 [0] : vector<8x8x1xf32> to vector<8x1xf32>
    %224 = vector.shape_cast %223 : vector<8x1xf32> to vector<1x8x1xf32>
    %225 = vector.broadcast %224 : vector<1x8x1xf32> to vector<8x8x1xf32>
    %226 = arith.divf %222, %225 : vector<8x8x1xf32>
    %227 = vector.broadcast %226 : vector<8x8x1xf32> to vector<8x8x64xf32>
    %228 = arith.mulf %206, %227 : vector<8x8x64xf32>
    %cst_48 = arith.constant dense<0.000000e+00> : vector<8x64xf32>
    %229 = vector.multi_reduction <add>, %228, %cst_48 [0] : vector<8x8x64xf32> to vector<8x64xf32>
    %c200 = arith.constant 200 : index
    %c0_49 = arith.constant 0 : index
    %230 = vector.load %arg3[%c200, %c0_49] : memref<272x128xf32, #tpu.memory_space<vmem>>, vector<64x128xf32>
    %c264 = arith.constant 264 : index
    %c0_50 = arith.constant 0 : index
    %231 = vector.load %arg3[%c264, %c0_50] : memref<272x128xf32, #tpu.memory_space<vmem>>, vector<1x128xf32>
    %cst_51 = arith.constant dense<0.000000e+00> : vector<8x128xf32>
    %232 = tpu.matmul %229, %230, %cst_51 {dimension_numbers = #tpu.dot_dimension_numbers<[1], [0], [0], [1], [0, 0, 1, 1], [], []>} : vector<8x64xf32>, vector<64x128xf32>, vector<8x128xf32> -> vector<8x128xf32>
    %233 = vector.broadcast %231 : vector<1x128xf32> to vector<8x128xf32>
    %234 = arith.addf %232, %233 : vector<8x128xf32>
    %c0_52 = arith.constant 0 : index
    %c0_53 = arith.constant 0 : index
    %235 = vector.load %arg4[%c0_52, %c0_53] : memref<8x128xf32, #tpu.memory_space<vmem>>, vector<8x128xf32>
    tpu.vector_store %arg4[%c0_52, %c0_53], %234 {strides = array<i32>} : memref<8x128xf32, #tpu.memory_space<vmem>>, vector<8x128xf32>,
    return
  }
  func.func @transform_0(%arg0: i32) -> (i32, i32, i32) {
    %c0_i32 = arith.constant 0 : i32
    %c0_i32_0 = arith.constant 0 : i32
    %c0_i32_1 = arith.constant 0 : i32
    return %arg0, %c0_i32, %c0_i32_0 : i32, i32, i32
  }
  func.func @transform_1(%arg0: i32) -> (i32, i32) {
    %c0_i32 = arith.constant 0 : i32
    %c0_i32_0 = arith.constant 0 : i32
    %c0_i32_1 = arith.constant 0 : i32
    return %c0_i32, %c0_i32_0 : i32, i32
  }
  func.func @transform_2(%arg0: i32) -> (i32, i32) {
    %c0_i32 = arith.constant 0 : i32
    %c0_i32_0 = arith.constant 0 : i32
    %c0_i32_1 = arith.constant 0 : i32
    return %c0_i32, %c0_i32_0 : i32, i32
  }
  func.func @transform_3(%arg0: i32) -> (i32, i32) {
    %c0_i32 = arith.constant 0 : i32
    %c0_i32_0 = arith.constant 0 : i32
    return %arg0, %c0_i32 : i32, i32
  }
}

</mosaic_0001>

<bundles_post_ra>
// kernel: attn_classifier_forward.1
= control target key start
LH: loop header
LB: loop body
LE: loop exit
PB: predicated region body
PF: predicated region fallthrough
CT: control target
= control target key end

     0   :  { %8 = vsyncpa [#allocation3], 0  ;;  %s2615_s0 = inlined_call_operand.vmem [shape: s32[1,64,2], index: 0, kind: input, shape index: {}]   ;;  %s2616_s1 = inlined_call_operand.hbm [shape: f32[104,512], index: 1, kind: input, shape index: {}]   ;;  %s2617_s2 = inlined_call_operand.hbm [shape: f32[272,128], index: 2, kind: input, shape index: {}]   ;;  %s2618_s3 = inlined_call_operand.vmem [shape: f32[8,128], index: 3, kind: output, shape index: {}]  }
   0x1   :  { %s16_s14 = sshll.u32 %s2616_s1, 4  ;;  %s17_s14 = int_to_ptr.hbm [resolvable:$true] %s16_s14 }
   0x2   :  { %9 = vsyncpa [#allocation5], 0  ;;  %s1850_s15 = smov [#allocation2]   ;;  %s29_s19 = sshll.u32 %s2617_s2, 4  ;;  %s30_s19 = int_to_ptr.hbm [resolvable:$true] %s29_s19 }
   0x3   :  { %s18_s16 = sshll.u32 %s1850_s15, 4  ;;  %s1851_s20 = smov 512   ;;  %s19_s16 = int_to_ptr.vmem [resolvable:$true] %s18_s16 }
   0x4   :  { %s1852_s21 = smov 32   ;;  %s1853_s22 = smov [#allocation4]  }
   0x5   :  { %24 = dma.hbm_to_vmem [thread:$0]  %s17_s14, 6656, %s19_s16, [#allocation3], %s1851_s20, %s1851_s20, %s1852_s21  }
   0x6   :  { %s31_s23 = sshll.u32 %s1853_s22, 4  ;;  %s1854_s24 = smov 128   ;;  %s32_s23 = int_to_ptr.vmem [resolvable:$true] %s31_s23 }
   0x7   :  { %s1855_s25 = smov 8  }
   0x8   :  { %37 = dma.hbm_to_vmem [thread:$0]  %s30_s19, 4352, %s32_s23, [#allocation5], %s1854_s24, %s1854_s24, %s1855_s25  }
   0x9   :  { %1846 = dma.done.wait [#allocation3], 6656  }
   0xa   :  { %1847 = vsyncadd [#allocation3], 4294960640 }
   0xb   :  { %1848 = dma.done.wait [#allocation5], 4352  }
   0xc   :  { %1849 = vsyncadd [#allocation5], 4294962944  ;;  %v1856_v0 = vmov 0   ;;  %v49_v1 = vld [vmem:[%s2615_s0 + $0x18] sm:$0xff]  ;;  %v48_v2 = vld [vmem:[%s2615_s0 + $0x10] sm:$0xff]  ;;  %v1857_v4 = vmov 1   ;;  %v54_v24 = vlaneseq }
   0xd   :  { %1677 = vset.pattern.permute.xlu1 %v1856_v0  ;;  %1675 = vset.pattern.permute.xlu0 %v1856_v0  ;;  %v50_v3 = vld [vmem:[%s2615_s0 + $0x20] sm:$0xff]  ;;  %v51_v5 = vld [vmem:[%s2615_s0 + $0x28] sm:$0xff]  ;;  %v52_v6 = vld [vmem:[%s2615_s0 + $0x30] sm:$0xff]  ;;  %v1858_v38 = vmov 0.0   ;;  %vm212_vm2 = vcmask 326656  }
   0xe   :  { %1679 = vset.pattern.permute.xlu2 %v1856_v0  ;;  %66 = vperm.xlu1 %1677, %v49_v1   ;;  %v46_v7 = vld [vmem:[%s2615_s0] sm:$0xff]  ;;  %v53_v8 = vld [vmem:[%s2615_s0 + $0x38] sm:$0xff]  ;;  %v47_v9 = vld [vmem:[%s2615_s0 + $0x8] sm:$0xff]  ;;  %v1913_v29 = vand.u32 127, %v54_v24 }
   0xf   :  { %63 = vperm.xlu0 %1675, %v48_v2   ;;  %69 = vperm.xlu2 %1679, %v50_v3   ;;  %v177_v10 = vld [vmem:[#allocation2 + $0x88] sm:$0xff]  ;;  %v179_v16 = vld [vmem:[#allocation2 + $0x98] sm:$0xff]  ;;  %v176_v17 = vld [vmem:[#allocation2 + $0x80] sm:$0xff] }
  0x10   :  { %v173_v11 = vld [vmem:[#allocation2 + $0x68] sm:$0xff]  ;;  %1661 = vmatpush.msra.mxu3 %v177_v10  ;;  %289 = vmatpush.msra.mxu1 %v177_v10  ;;  %v172_v18 = vld [vmem:[#allocation2 + $0x60] sm:$0xff]  ;;  %v175_v23 = vld [vmem:[#allocation2 + $0x78] sm:$0xff]  ;;  %2621 = vst [vmem:[#allocation8_spill] sm:$0xff] %v1913_v29 }
  0x11   :  { %v169_v12 = vld [vmem:[#allocation2 + $0x48] sm:$0xff]  ;;  %1656 = vmatpush.msra.mxu2 %v176_v17  ;;  %v168_v19 = vld [vmem:[#allocation2 + $0x40] sm:$0xff]  ;;  %248 = vmatpush.msra.mxu0 %v176_v17  ;;  %v171_v27 = vld [vmem:[#allocation2 + $0x58] sm:$0xff] }
  0x12   :  { %1662 = vmatpush.msra.mxu3 %v173_v11  ;;  %290 = vmatpush.msra.mxu1 %v173_v11  ;;  %v165_v13 = vld [vmem:[#allocation2 + $0x28] sm:$0xff]  ;;  %v164_v20 = vld [vmem:[#allocation2 + $0x20] sm:$0xff]  ;;  %v178_v30 = vld [vmem:[#allocation2 + $0x90] sm:$0xff] }
  0x13   :  { %v161_v14 = vld [vmem:[#allocation2 + $0x8] sm:$0xff]  ;;  %1657 = vmatpush.msra.mxu2 %v172_v18  ;;  %249 = vmatpush.msra.mxu0 %v172_v18  ;;  %v160_v21 = vld [vmem:[#allocation2] sm:$0xff]  ;;  %v174_v31 = vld [vmem:[#allocation2 + $0x70] sm:$0xff] }
  0x14   :  { %1663 = vmatpush.msra.mxu3 %v169_v12  ;;  %291 = vmatpush.msra.mxu1 %v169_v12  ;;  %v1916_v32 = vld [vmem:[#allocation2 + $0x188] sm:$0xff]  ;;  %v170_v33 = vld [vmem:[#allocation2 + $0x50] sm:$0xff]  ;;  %v167_v35 = vld [vmem:[#allocation2 + $0x38] sm:$0xff] }
  0x15   :  { %1658 = vmatpush.msra.mxu2 %v168_v19  ;;  %250 = vmatpush.msra.mxu0 %v168_v19  ;;  %v1919_v36 = vld [vmem:[#allocation2 + $0x168] sm:$0xff]  ;;  %v166_v43 = vld [vmem:[#allocation2 + $0x30] sm:$0xff]  ;;  %v163_v51 = vld [vmem:[#allocation2 + $0x18] sm:$0xff] }
  0x16   :  { %1678 = vset.pattern.permute.xlu1 %v1857_v4  ;;  %1664 = vmatpush.msra.mxu3 %v165_v13  ;;  %v1929_v44 = vld [vmem:[#allocation2 + $0x148] sm:$0xff]  ;;  %v162_v45 = vld [vmem:[#allocation2 + $0x10] sm:$0xff]  ;;  %v2002_v11 = vld [vmem:[#allocation2 + $0x160] sm:$0xff] }
  0x17   :  { %1676 = vset.pattern.permute.xlu0 %v1857_v4  ;;  %114 = vperm.xlu1 %1678, %v49_v1   ;;  %v1937_v46 = vld [vmem:[#allocation2 + $0x128] sm:$0xff]  ;;  %v2000_v10 = vld [vmem:[#allocation2 + $0x190] sm:$0xff]  ;;  %v2019_v18 = vld [vmem:[#allocation2 + $0x178] sm:$0xff] }
  0x18   :  { %111 = vperm.xlu0 %1676, %v48_v2   ;;  %1680 = vset.pattern.permute.xlu2 %v1857_v4  ;;  %v1942_v49 = vld [vmem:[#allocation2 + $0x108] sm:$0xff]  ;;  %v2022_v19 = vld [vmem:[#allocation2 + $0x120] sm:$0xff] }
  0x19   :  { %117 = vperm.xlu2 %1680, %v50_v3   ;;  %292 = vmatpush.msra.mxu1 %v165_v13  ;;  %v1944_v50 = vld [vmem:[#allocation2 + $0xe8] sm:$0xff] }
  0x1a   :  { %1665 = vmatpush.msra.mxu3 %v161_v14  ;;  %1659 = vmatpush.msra.mxu2 %v164_v20  ;;  %v1955_v59 = vld [vmem:[#allocation2 + $0xc8] sm:$0xff] }
  0x1b   :  { %293 = vmatpush.msra.mxu1 %v161_v14  ;;  %251 = vmatpush.msra.mxu0 %v164_v20  ;;  %v1966_v60 = vld [vmem:[#allocation2 + $0xa8] sm:$0xff]  ;;  %v2029_v20 = vld [vmem:[#allocation2 + $0x100] sm:$0xff] }
  0x1c   :  { %371 = vmatpush.msrb.mxu3 %v179_v16  ;;  %1660 = vmatpush.msra.mxu2 %v160_v21 }
  0x1d   :  { %252 = vmatpush.msra.mxu0 %v160_v21  ;;  %433 = vmatpush.msrb.mxu1 %v1916_v32  ;;  %v2031_v21 = vld [vmem:[#allocation2 + $0x170] sm:$0xff] }
  0x1e   :  { %372 = vmatpush.msrb.mxu3 %v175_v23  ;;  %330 = vmatpush.msrb.mxu2 %v178_v30  ;;  %v2052_v30 = vld [vmem:[#allocation2 + $0xa0] sm:$0xff] }
  0x1f   :  { %1681 = vset.pattern.permute.xlu1 %v1856_v0  ;;  %434 = vmatpush.msrb.mxu1 %v1919_v36 }
  0x20   :  { %1682 = vset.pattern.permute.xlu0 %v1856_v0  ;;  %72 = vperm.xlu1 %1681, %v51_v5  }
  0x21   :  { %75 = vperm.xlu0 %1682, %v52_v6   ;;  %120 = vperm.xlu2 %1680, %v51_v5  }
  0x22   :  { %373 = vmatpush.msrb.mxu3 %v171_v27  ;;  %331 = vmatpush.msrb.mxu2 %v174_v31  ;;  %v2049_v27 = vld [vmem:[#allocation2 + $0x158] sm:$0xff]  ;;  %v2060_v31 = vld [vmem:[#allocation2 + $0x150] sm:$0xff] }
  0x23   :  { %435 = vmatpush.msrb.mxu1 %v1929_v44 }
  0x24   :  { %374 = vmatpush.msrb.mxu3 %v167_v35  ;;  %332 = vmatpush.msrb.mxu2 %v170_v33  ;;  %v2068_v33 = vld [vmem:[#allocation2 + $0x138] sm:$0xff] }
  0x25   :  { %436 = vmatpush.msrb.mxu1 %v1937_v46  ;;  %v2086_v35 = vld [vmem:[#allocation2 + $0x118] sm:$0xff] }
  0x26   :  { %333 = vmatpush.msrb.mxu2 %v166_v43  ;;  %375 = vmatpush.msrb.mxu3 %v163_v51  ;;  %v2120_v43 = vld [vmem:[#allocation2 + $0xd8] sm:$0xff] }
  0x27   :  { %437 = vmatpush.msrb.mxu1 %v1942_v49 }
  0x28   :  { %1683 = vset.pattern.permute.xlu1 %v1857_v4  ;;  %334 = vmatpush.msrb.mxu2 %v162_v45  ;;  %v2122_v45 = vld [vmem:[#allocation2 + $0xb0] sm:$0xff] }
  0x29   :  { %1685 = vset.pattern.permute.xlu0 %v1857_v4  ;;  %123 = vperm.xlu1 %1683, %v52_v6  }
  0x2a   :  { %105 = vperm.xlu0 %1685, %v46_v7   ;;  %1684 = vset.pattern.permute.xlu2 %v1856_v0 }
  0x2b   :  { %78 = vperm.xlu2 %1684, %v53_v8   ;;  %438 = vmatpush.msrb.mxu1 %v1944_v50 }
  0x2d   :  { %439 = vmatpush.msrb.mxu1 %v1955_v59 }
  0x2f   :  { %440 = vmatpush.msrb.mxu1 %v1966_v60 }
  0x31   :  { %126 = vperm.xlu1 %1683, %v53_v8   ;;  %v1987_v8 = vld [vmem:[#allocation2 + $0x198] sm:$0xff] }
  0x32   :  { %1689 = vset.pattern.permute.xlu0 %v1856_v0 }
  0x33   :  { %57 = vperm.xlu2 %1684, %v46_v7  }
  0x39   :  { %1686 = vset.pattern.permute.xlu1 %v1856_v0 }
  0x3a   :  { %60 = vperm.xlu1 %1686, %v47_v9  }
  0x3b   :  { %1687 = vset.pattern.permute.xlu2 %v1857_v4 }
  0x3c   :  { %108 = vperm.xlu2 %1687, %v47_v9   ;;  %v1998_v9 = vld [vmem:[#allocation2 + $0x180] sm:$0xff] }
  0x3d   :  { %413 = vmatpush.msrb.mxu0 %v1998_v9 }
  0x3f   :  { %414 = vmatpush.msrb.mxu0 %v2002_v11 }
  0x44   :  { %1688 = vset.pattern.permute.xlu2 %v1856_v0 }
  0x69   :  { %v1909_v15 = vpop.permute.xlu2 %69 }
  0x6a   :  { %vm84_vm7 = vcmp.eq.s32.totalorder %v1913_v29, %v1909_v15  ;;  %v2011_v15 = vld [vmem:[#allocation2 + $0x140] sm:$0xff] }
  0x6b   :  { %v1575_v61 = vsel %vm84_vm7, 1.0, %v1858_v38  ;;  %415 = vmatpush.msrb.mxu0 %v2011_v15 }
  0x6d   :  { %416 = vmatpush.msrb.mxu0 %v2022_v19 }
  0x6f   :  { %417 = vmatpush.msrb.mxu0 %v2029_v20 }
  0x73   :  { %v1911_v22 = vpop.permute.xlu2 %117 }
  0x74   :  { %vm132_vm8 = vcmp.eq.s32.totalorder %v1913_v29, %v1911_v22  ;;  %v2033_v22 = vld [vmem:[#allocation2 + $0xe0] sm:$0xff] }
  0x75   :  { %v1583_v62 = vsel %vm132_vm8, 1.0, %v1858_v38  ;;  %418 = vmatpush.msrb.mxu0 %v2033_v22 }
  0x76   :  { %v1975_v3 = vadd.f32 %v1583_v62, %v1575_v61 }
  0x7b   :  { %v121_v28 = vpop.permute.xlu2 %120 }
  0x7c   :  { %vm133_vm5 = vcmp.eq.s32.totalorder %v1913_v29, %v121_v28 }
  0x7d   :  { %v1584_v52 = vsel %vm133_vm5, 1.0, %v1858_v38 }
  0x80   :  { %v67_v26 = vpop.permute.xlu1 %66 }
  0x81   :  { %v64_v25 = vpop.permute.xlu0 %63  ;;  %vm83_vm3 = vcmp.eq.s32.totalorder %v1913_v29, %v67_v26 }
  0x82   :  { %vm82_vm0 = vcmp.eq.s32.totalorder %v1913_v29, %v64_v25  ;;  %v1574_v47 = vsel %vm83_vm3, 1.0, %v1858_v38  ;;  %v2042_v25 = vld [vmem:[#allocation2 + $0xc0] sm:$0xff]  ;;  %vm1391_vm3 = vcmask 7168  }
  0x83   :  { %v1573_v39 = vsel %vm82_vm0, 1.0, %v1858_v38  ;;  %419 = vmatpush.msrb.mxu0 %v2042_v25 }
  0x85   :  { %v1924_v41 = vpop.permute.xlu2 %78  ;;  %420 = vmatpush.msrb.mxu0 %v2052_v30 }
  0x86   :  { %vm87_vm13 = vcmp.eq.s32.totalorder %v1913_v29, %v1924_v41  ;;  %v2110_v41 = vld [vmem:[#allocation2 + $0xd0] sm:$0xff] }
  0x87   :  { %v1578_v12 = vsel %vm87_vm13, 1.0, %v1858_v38 }
  0x89   :  { %v115_v37 = vpop.permute.xlu1 %114 }
  0x8a   :  { %v112_v34 = vpop.permute.xlu0 %111  ;;  %vm131_vm4 = vcmp.eq.s32.totalorder %v1913_v29, %v115_v37  ;;  %v2093_v37 = vld [vmem:[#allocation2 + $0x110] sm:$0xff] }
  0x8b   :  { %vm130_vm1 = vcmp.eq.s32.totalorder %v1913_v29, %v112_v34  ;;  %v1582_v48 = vsel %vm131_vm4, 1.0, %v1858_v38  ;;  %v2073_v34 = vld [vmem:[#allocation2 + $0x130] sm:$0xff] }
  0x8c   :  { %v1581_v40 = vsel %vm130_vm1, 1.0, %v1858_v38  ;;  %v1949_v55 = vadd.f32 %v1582_v48, %v1574_v47  ;;  %vm401_vm1 = vcmask 523264  }
  0x8d   :  { %v1927_v42 = vadd.f32 %v1581_v40, %v1573_v39  ;;  %v58_v58 = vpop.permute.xlu2 %57  ;;  %v2102_v39 = vld [vmem:[#allocation2 + $0xf8] sm:$0xff]  ;;  %v2108_v40 = vld [vmem:[#allocation2 + $0xf0] sm:$0xff] }
  0x8e   :  { %vm80_vm10 = vcmp.eq.s32.totalorder %v1913_v29, %v58_v58 }
  0x8f   :  { %1597 = vmatmul.msk.f32.vlgmr.msra.gmra.mxu3 %vm212_vm2, %v1927_v42  ;;  %v1571_v2 = vsel %vm80_vm10, 1.0, %v1858_v38 }
  0x90   :  { %473 = vmatpush.msra.mxu3 %v1987_v8 }
  0x92   :  { %v73_v53 = vpop.permute.xlu1 %72  ;;  %474 = vmatpush.msra.mxu3 %v2019_v18 }
  0x93   :  { %v76_v54 = vpop.permute.xlu0 %75  ;;  %vm85_vm6 = vcmp.eq.s32.totalorder %v1913_v29, %v73_v53 }
  0x94   :  { %v1576_v56 = vsel %vm85_vm6, 1.0, %v1858_v38  ;;  %vm86_vm9 = vcmp.eq.s32.totalorder %v1913_v29, %v76_v54  ;;  %475 = vmatpush.msra.mxu3 %v2049_v27 }
  0x95   :  { %v1953_v57 = vadd.f32 %v1584_v52, %v1576_v56  ;;  %v1577_v0 = vsel %vm86_vm9, 1.0, %v1858_v38 }
  0x96   :  { %v109_v17 = vpop.permute.xlu2 %108  ;;  %476 = vmatpush.msra.mxu3 %v2068_v33 }
  0x97   :  { %1598 = vmatmul.msk.f32.gmra.mxu3 %vm212_vm2, %v1949_v55  ;;  %1592 = vmatmul.msk.f32.vlgmr.msra.gmra.mxu2 %vm212_vm2, %v1953_v57  ;;  %vm129_vm15 = vcmp.eq.s32.totalorder %v1913_v29, %v109_v17 }
  0x98   :  { %453 = vmatpush.msra.mxu2 %v2000_v10  ;;  %v1580_v24 = vsel %vm129_vm15, 1.0, %v1858_v38  ;;  %477 = vmatpush.msra.mxu3 %v2086_v35 }
  0x9a   :  { %454 = vmatpush.msra.mxu2 %v2031_v21  ;;  %478 = vmatpush.msra.mxu3 %v2102_v39 }
  0x9b   :  { %v124_v63 = vpop.permute.xlu1 %123 }
  0x9c   :  { %v106_v1 = vpop.permute.xlu0 %105  ;;  %vm134_vm11 = vcmp.eq.s32.totalorder %v1913_v29, %v124_v63  ;;  %455 = vmatpush.msra.mxu2 %v2060_v31  ;;  %479 = vmatpush.msra.mxu3 %v2120_v43 }
  0x9d   :  { %vm128_vm12 = vcmp.eq.s32.totalorder %v1913_v29, %v106_v1  ;;  %v1585_v4 = vsel %vm134_vm11, 1.0, %v1858_v38 }
  0x9e   :  { %v1579_v5 = vsel %vm128_vm12, 1.0, %v1858_v38  ;;  %v1981_v6 = vadd.f32 %v1585_v4, %v1577_v0  ;;  %456 = vmatpush.msra.mxu2 %v2073_v34 }
  0x9f   :  { %1599 = vmatmul.msk.f32.gmra.mxu3 %vm212_vm2, %v1975_v3  ;;  %v1985_v7 = vadd.f32 %v1579_v5, %v1571_v2 }
  0xa0   :  { %1593 = vmatmul.msk.f32.gmra.mxu2 %vm212_vm2, %v1981_v6 }
  0xa1   :  { %1587 = vmatmul.msk.f32.vlgmr.msra.gmra.mxu0 %vm212_vm2, %v1985_v7  ;;  %1595 = vmatmul.msk.f32.vlgmr.msra.gmra.mxu1 %vm212_vm2, %v1985_v7 }
  0xa2   :  { %538 = vmatpush.msra.mxu1 %v1916_v32  ;;  %518 = vmatpush.msra.mxu0 %v1998_v9 }
  0xa3   :  { %v127_v13 = vpop.permute.xlu1 %126  ;;  %457 = vmatpush.msra.mxu2 %v2093_v37 }
  0xa4   :  { %vm135_vm14 = vcmp.eq.s32.totalorder %v1913_v29, %v127_v13  ;;  %539 = vmatpush.msra.mxu1 %v1919_v36  ;;  %519 = vmatpush.msra.mxu0 %v2002_v11 }
  0xa5   :  { %v1586_v14 = vsel %vm135_vm14, 1.0, %v1858_v38  ;;  %458 = vmatpush.msra.mxu2 %v2108_v40 }
  0xa6   :  { %v2014_v16 = vadd.f32 %v1586_v14, %v1578_v12  ;;  %540 = vmatpush.msra.mxu1 %v1929_v44  ;;  %520 = vmatpush.msra.mxu0 %v2011_v15 }
  0xa7   :  { %1600 = vmatmul.msk.f32.gmra.mxu3 %vm212_vm2, %v1953_v57  ;;  %459 = vmatpush.msra.mxu2 %v2110_v41 }
  0xa8   :  { %1594 = vmatmul.msk.f32.gmra.mxu2 %vm212_vm2, %v2014_v16  ;;  %541 = vmatpush.msra.mxu1 %v1937_v46 }
  0xa9   :  { %521 = vmatpush.msra.mxu0 %v2022_v19  ;;  %460 = vmatpush.msra.mxu2 %v2122_v45 }
  0xaa   :  { %542 = vmatpush.msra.mxu1 %v1942_v49 }
  0xab   :  { %522 = vmatpush.msra.mxu0 %v2029_v20 }
  0xac   :  { %v61_v23 = vpop.permute.xlu1 %60  ;;  %543 = vmatpush.msra.mxu1 %v1944_v50 }
  0xad   :  { %vm81_vm0 = vcmp.eq.s32.totalorder %v1913_v29, %v61_v23  ;;  %523 = vmatpush.msra.mxu0 %v2033_v22 }
  0xae   :  { %v1572_v26 = vsel %vm81_vm0, 1.0, %v1858_v38  ;;  %544 = vmatpush.msra.mxu1 %v1955_v59 }
  0xaf   :  { %1601 = vmatmul.msk.f32.gmra.mxu3 %vm212_vm2, %v1981_v6  ;;  %v153_v28 = vadd.f32 %v1580_v24, %v1572_v26  ;;  %524 = vmatpush.msra.mxu0 %v2042_v25 }
  0xb0   :  { %1603 = vmatmul.msk.f32.vlgmr.msrb.gmra.mxu2 %vm212_vm2, %v1985_v7  ;;  %545 = vmatpush.msra.mxu1 %v1966_v60 }
  0xb1   :  { %1588 = vmatmul.msk.f32.gmra.mxu0 %vm212_vm2, %v153_v28  ;;  %1596 = vmatmul.msk.f32.gmra.mxu1 %vm212_vm2, %v153_v28 }
  0xb2   :  { %525 = vmatpush.msra.mxu0 %v2052_v30  ;;  %558 = vmatpush.msrb.mxu2 %v2000_v10 }
  0xb4   :  { %559 = vmatpush.msrb.mxu2 %v2031_v21 }
  0xb6   :  { %560 = vmatpush.msrb.mxu2 %v2060_v31 }
  0xb7   :  { %1602 = vmatmul.msk.f32.gmra.mxu3 %vm212_vm2, %v2014_v16 }
  0xb8   :  { %1604 = vmatmul.msk.f32.gmra.mxu2 %vm212_vm2, %v153_v28 }
  0xb9   :  { %1589 = vmatmul.msk.f32.gmra.mxu0 %vm212_vm2, %v1927_v42  ;;  %441 = vmatmul.f32.vlgmr.msrb.gmra.mxu1 %v1858_v38 }
  0xba   :  { %643 = vmatpush.msrb.mxu1 %v1916_v32  ;;  %561 = vmatpush.msrb.mxu2 %v2073_v34 }
  0xbc   :  { %644 = vmatpush.msrb.mxu1 %v1919_v36  ;;  %562 = vmatpush.msrb.mxu2 %v2093_v37 }
  0xbe   :  { %645 = vmatpush.msrb.mxu1 %v1929_v44  ;;  %563 = vmatpush.msrb.mxu2 %v2108_v40 }
  0xbf   :  { %1611 = vmatmul.msk.f32.vlgmr.msrb.gmra.mxu3 %vm212_vm2, %v1985_v7 }
  0xc0   :  { %1605 = vmatmul.msk.f32.gmra.mxu2 %vm212_vm2, %v1927_v42  ;;  %646 = vmatpush.msrb.mxu1 %v1937_v46 }
  0xc1   :  { %1590 = vmatmul.msk.f32.gmra.mxu0 %vm212_vm2, %v1949_v55  ;;  %564 = vmatpush.msrb.mxu2 %v2110_v41 }
  0xc2   :  { %647 = vmatpush.msrb.mxu1 %v1942_v49 }
  0xc3   :  { %565 = vmatpush.msrb.mxu2 %v2122_v45 }
  0xc4   :  { %648 = vmatpush.msrb.mxu1 %v1944_v50 }
  0xc6   :  { %649 = vmatpush.msrb.mxu1 %v1955_v59 }
  0xc7   :  { %1612 = vmatmul.msk.f32.gmra.mxu3 %vm212_vm2, %v153_v28 }
  0xc8   :  { %1606 = vmatmul.msk.f32.gmra.mxu2 %vm212_vm2, %v1949_v55  ;;  %650 = vmatpush.msrb.mxu1 %v1966_v60 }
  0xc9   :  { %1591 = vmatmul.msk.f32.gmra.mxu0 %vm212_vm2, %v1975_v3 }
  0xcf   :  { %1613 = vmatmul.msk.f32.gmra.mxu3 %vm212_vm2, %v1927_v42  ;;  %v2136_v42 = vld [vmem:[#allocation2 + $0xb8] sm:$0xff] }
  0xd0   :  { %1607 = vmatmul.msk.f32.gmra.mxu2 %vm212_vm2, %v1975_v3  ;;  %480 = vmatpush.msra.mxu3 %v2136_v42 }
  0xd1   :  { %421 = vmatmul.f32.vlgmr.msrb.gmra.mxu0 %v1858_v38 }
  0xd2   :  { %623 = vmatpush.msrb.mxu0 %v1998_v9  ;;  %578 = vmatpush.msrb.mxu3 %v1987_v8 }
  0xd4   :  { %624 = vmatpush.msrb.mxu0 %v2002_v11  ;;  %579 = vmatpush.msrb.mxu3 %v2019_v18 }
  0xd6   :  { %625 = vmatpush.msrb.mxu0 %v2011_v15  ;;  %580 = vmatpush.msrb.mxu3 %v2049_v27 }
  0xd7   :  { %1614 = vmatmul.msk.f32.gmra.mxu3 %vm212_vm2, %v1949_v55 }
  0xd8   :  { %1608 = vmatmul.msk.f32.gmra.mxu2 %vm212_vm2, %v1953_v57  ;;  %626 = vmatpush.msrb.mxu0 %v2022_v19 }
  0xd9   :  { %581 = vmatpush.msrb.mxu3 %v2068_v33 }
  0xda   :  { %627 = vmatpush.msrb.mxu0 %v2029_v20 }
  0xdb   :  { %582 = vmatpush.msrb.mxu3 %v2086_v35 }
  0xdc   :  { %628 = vmatpush.msrb.mxu0 %v2033_v22 }
  0xdd   :  { %583 = vmatpush.msrb.mxu3 %v2102_v39 }
  0xde   :  { %629 = vmatpush.msrb.mxu0 %v2042_v25 }
  0xdf   :  { %1615 = vmatmul.msk.f32.gmra.mxu3 %vm212_vm2, %v1975_v3 }
  0xe0   :  { %1609 = vmatmul.msk.f32.gmra.mxu2 %vm212_vm2, %v1981_v6  ;;  %630 = vmatpush.msrb.mxu0 %v2052_v30 }
  0xe1   :  { %584 = vmatpush.msrb.mxu3 %v2120_v43 }
  0xe3   :  { %585 = vmatpush.msrb.mxu3 %v2136_v42 }
  0xe7   :  { %1616 = vmatmul.msk.f32.gmra.mxu3 %vm212_vm2, %v1953_v57 }
  0xe8   :  { %1610 = vmatmul.msk.f32.gmra.mxu2 %vm212_vm2, %v2014_v16 }
  0xef   :  { %1617 = vmatmul.msk.f32.gmra.mxu3 %vm212_vm2, %v1981_v6 }
  0xf0   :  { %461 = vmatmul.f32.vlgmr.msra.gmra.mxu2 %v1858_v38 }
  0xf1   :  { %663 = vmatpush.msra.mxu2 %v2000_v10 }
  0xf3   :  { %664 = vmatpush.msra.mxu2 %v2031_v21 }
  0xf5   :  { %665 = vmatpush.msra.mxu2 %v2060_v31 }
  0xf7   :  { %1618 = vmatmul.msk.f32.gmra.mxu3 %vm212_vm2, %v2014_v16  ;;  %666 = vmatpush.msra.mxu2 %v2073_v34 }
  0xf9   :  { %667 = vmatpush.msra.mxu2 %v2093_v37 }
  0xfb   :  { %668 = vmatpush.msra.mxu2 %v2108_v40 }
  0xfd   :  { %669 = vmatpush.msra.mxu2 %v2110_v41 }
  0xff   :  { %481 = vmatmul.f32.vlgmr.msra.gmra.mxu3 %v1858_v38  ;;  %670 = vmatpush.msra.mxu2 %v2122_v45 }
 0x100   :  { %683 = vmatpush.msra.mxu3 %v1987_v8 }
 0x102   :  { %684 = vmatpush.msra.mxu3 %v2019_v18 }
 0x104   :  { %685 = vmatpush.msra.mxu3 %v2049_v27 }
 0x106   :  { %686 = vmatpush.msra.mxu3 %v2068_v33 }
 0x108   :  { %687 = vmatpush.msra.mxu3 %v2086_v35 }
 0x10a   :  { %688 = vmatpush.msra.mxu3 %v2102_v39 }
 0x10c   :  { %689 = vmatpush.msra.mxu3 %v2120_v43 }
 0x10e   :  { %690 = vmatpush.msra.mxu3 %v2136_v42 }
 0x112   :  { %v2190_v47 = vpop.f32.mrf.mxu3 }
 0x11a   :  { %v2192_v38 = vpop.f32.mrf.mxu3  ;;  %v2194_v48 = vpop.f32.mrf.mxu2 }
 0x11b   :  { %2622 = vst [vmem:[#allocation9_spill] sm:$0xff] %v2194_v48 }
 0x11e   :  { %v254_v61 = vpop.f32.mrf.mxu0  ;;  %v295_v7 = vpop.f32.mrf.mxu1 }
 0x122   :  { %v2196_v51 = vpop.f32.mrf.mxu3 }
 0x123   :  { %2623 = vst [vmem:[#allocation10_spill] sm:$0xff] %v2196_v51  ;;  %v2198_v52 = vpop.f32.mrf.mxu2 }
 0x124   :  { %2624 = vst [vmem:[#allocation11_spill] sm:$0xff] %v2198_v52 }
 0x12a   :  { %v2200_v53 = vpop.f32.mrf.mxu3 }
 0x12b   :  { %2625 = vst [vmem:[#allocation12_spill] sm:$0xff] %v2200_v53  ;;  %v2202_v54 = vpop.f32.mrf.mxu2 }
 0x12c   :  { %2626 = vst [vmem:[#allocation13_spill] sm:$0xff] %v2202_v54 }
 0x12e   :  { %v2212_v0 = vpop.f32.mrf.mxu0  ;;  %v2232_v16 = vpop.f32.mrf.mxu1 }
 0x132   :  { %v2204_v55 = vpop.f32.mrf.mxu3 }
 0x133   :  { %2627 = vst [vmem:[#allocation14_spill] sm:$0xff] %v2204_v55  ;;  %v336_v56 = vpop.f32.mrf.mxu2 }
 0x136   :  { %v2220_v4 = vpop.f32.mrf.mxu0  ;;  %v442_v26 = vpop.f32.mrf.mxu1 }
 0x13a   :  { %v2206_v57 = vpop.f32.mrf.mxu3 }
 0x13b   :  { %2628 = vst [vmem:[#allocation15_spill] sm:$0xff] %v2206_v57  ;;  %v2208_v58 = vpop.f32.mrf.mxu2  ;;  %v486_v57 = vadd.f32 %v442_v26, %v295_v7 }
 0x13d   :  { %v490_v52 = vmul.f32 0.5, %v486_v57 }
 0x13e   :  { %v2226_v12 = vpop.f32.mrf.mxu0 }
 0x13f   :  { %1692 = vtanh.f32 %v490_v52 }
 0x142   :  { %v377_v62 = vpop.f32.mrf.mxu3 }
 0x143   :  { %v2210_v63 = vpop.f32.mrf.mxu2 }
 0x146   :  { %v2234_v17 = vpop.f32.mrf.mxu0 }
 0x147   :  { %2633 = vst [vmem:[#allocation20_spill] sm:$0xff] %v2234_v17 }
 0x14a   :  { %v2214_v1 = vpop.f32.mrf.mxu3 }
 0x14b   :  { %v2216_v2 = vpop.f32.mrf.mxu2 }
 0x14e   :  { %v422_v28 = vpop.f32.mrf.mxu0 }
 0x14f   :  { %v485_v55 = vadd.f32 %v422_v28, %v254_v61 }
 0x152   :  { %v2218_v3 = vpop.f32.mrf.mxu3 }
 0x153   :  { %v2222_v5 = vpop.f32.mrf.mxu2 }
 0x154   :  { %2629 = vst [vmem:[#allocation16_spill] sm:$0xff] %v2222_v5  ;;  %v1693_v5 = vpop.eup %1692 }
 0x155   :  { %v496_v17 = vadd.f32 1.0, %v1693_v5 }
 0x157   :  { %v499_v7 = vmul.f32 0.5, %v496_v17 }
 0x159   :  { %v502_v57 = vmul.f32 0.0, %v499_v7 }
 0x15a   :  { %v2224_v6 = vpop.f32.mrf.mxu3 }
 0x15b   :  { %2630 = vst [vmem:[#allocation17_spill] sm:$0xff] %v2224_v6  ;;  %v2228_v13 = vpop.f32.mrf.mxu2 }
 0x15c   :  { %2631 = vst [vmem:[#allocation18_spill] sm:$0xff] %v2228_v13  ;;  %v489_v13 = vmul.f32 0.5, %v485_v55 }
 0x15e   :  { %1694 = vtanh.f32 %v489_v13 }
 0x162   :  { %v2230_v14 = vpop.f32.mrf.mxu3 }
 0x163   :  { %2632 = vst [vmem:[#allocation19_spill] sm:$0xff] %v2230_v14  ;;  %v2236_v23 = vpop.f32.mrf.mxu2 }
 0x164   :  { %2634 = vst [vmem:[#allocation21_spill] sm:$0xff] %v2236_v23  ;;  %v1695_v51 = vpop.eup %1694 }
 0x16a   :  { %v2238_v24 = vpop.f32.mrf.mxu3 }
 0x16b   :  { %2635 = vst [vmem:[#allocation22_spill] sm:$0xff] %v2238_v24  ;;  %v2242_v54 = vpop.f32.mrf.mxu2 }
 0x172   :  { %v2240_v29 = vpop.f32.mrf.mxu3 }
 0x173   :  { %2636 = vst [vmem:[#allocation23_spill] sm:$0xff] %v2240_v29  ;;  %v462_v48 = vpop.f32.mrf.mxu2  ;;  %v495_v29 = vadd.f32 1.0, %v1695_v51 }
 0x174   :  { %v487_v14 = vadd.f32 %v462_v48, %v336_v56 }
 0x175   :  { %v498_v26 = vmul.f32 0.5, %v495_v29 }
 0x176   :  { %v491_v6 = vmul.f32 0.5, %v487_v14 }
 0x17a   :  { %v2244_v53 = vpop.f32.mrf.mxu3 }
 0x17b   :  { %2637 = vst [vmem:[#allocation24_spill] sm:$0xff] %v2244_v53 }
 0x182   :  { %v482_v23 = vpop.f32.mrf.mxu3 }
 0x183   :  { %v488_v24 = vadd.f32 %v482_v23, %v377_v62 }
 0x185   :  { %1696 = vtanh.f32 %v488_v24 }
 0x186   :  { %1698 = vtanh.f32 %v491_v6 }
 0x18b   :  { %v1697_v61 = vpop.eup %1696 }
 0x18c   :  { %v503_v55 = vmul.f32 %v1697_v61, %v498_v26  ;;  %v1699_v28 = vpop.eup %1698 }
 0x18d   :  { %v497_v48 = vadd.f32 1.0, %v1699_v28 }
 0x18e   :  { %v2246_v53 = vadd.f32 %v503_v55, %v502_v57 }
 0x18f   :  { %v500_v52 = vmul.f32 0.5, %v497_v48 }
 0x190   :  { %1700 = vtanh.f32 %v2246_v53 }
 0x196   :  { %v1701_v56 = vpop.eup %1700 }
 0x197   :  { %v2249_v62 = vmul.f32 %v1701_v56, %v500_v52 }
 0x199   :  { %1619 = vmatmul.msk.f32.vlgmr.msra.gmra.mxu0 %vm401_vm1, %v2249_v62  ;;  %1620 = vmatmul.msk.f32.vlgmr.msra.gmra.mxu1 %vm401_vm1, %v2249_v62 }
 0x19a   :  { %1621 = vmatmul.msk.f32.vlgmr.msrb.gmra.mxu2 %vm401_vm1, %v2249_v62  ;;  %1622 = vmatmul.msk.f32.vlgmr.msrb.gmra.mxu3 %vm401_vm1, %v2249_v62 }
 0x19b   :  { %728 = vmatpush.msra.mxu0 %v1998_v9  ;;  %748 = vmatpush.msra.mxu1 %v1916_v32 }
 0x19c   :  { %768 = vmatpush.msrb.mxu2 %v2000_v10  ;;  %788 = vmatpush.msrb.mxu3 %v1987_v8 }
 0x19d   :  { %729 = vmatpush.msra.mxu0 %v2002_v11  ;;  %749 = vmatpush.msra.mxu1 %v1919_v36 }
 0x19e   :  { %769 = vmatpush.msrb.mxu2 %v2031_v21  ;;  %789 = vmatpush.msrb.mxu3 %v2019_v18 }
 0x19f   :  { %730 = vmatpush.msra.mxu0 %v2011_v15  ;;  %750 = vmatpush.msra.mxu1 %v1929_v44 }
 0x1a0   :  { %770 = vmatpush.msrb.mxu2 %v2060_v31  ;;  %790 = vmatpush.msrb.mxu3 %v2049_v27 }
 0x1a1   :  { %731 = vmatpush.msra.mxu0 %v2022_v19  ;;  %751 = vmatpush.msra.mxu1 %v1937_v46 }
 0x1a2   :  { %771 = vmatpush.msrb.mxu2 %v2073_v34  ;;  %791 = vmatpush.msrb.mxu3 %v2068_v33 }
 0x1a3   :  { %732 = vmatpush.msra.mxu0 %v2029_v20  ;;  %752 = vmatpush.msra.mxu1 %v1942_v49 }
 0x1a4   :  { %772 = vmatpush.msrb.mxu2 %v2093_v37  ;;  %792 = vmatpush.msrb.mxu3 %v2086_v35 }
 0x1a5   :  { %733 = vmatpush.msra.mxu0 %v2033_v22  ;;  %753 = vmatpush.msra.mxu1 %v1944_v50 }
 0x1a6   :  { %773 = vmatpush.msrb.mxu2 %v2108_v40  ;;  %793 = vmatpush.msrb.mxu3 %v2102_v39 }
 0x1a7   :  { %734 = vmatpush.msra.mxu0 %v2042_v25  ;;  %754 = vmatpush.msra.mxu1 %v1955_v59 }
 0x1a8   :  { %774 = vmatpush.msrb.mxu2 %v2110_v41  ;;  %794 = vmatpush.msrb.mxu3 %v2120_v43 }
 0x1a9   :  { %735 = vmatpush.msra.mxu0 %v2052_v30  ;;  %755 = vmatpush.msra.mxu1 %v1966_v60 }
 0x1aa   :  { %775 = vmatpush.msrb.mxu2 %v2122_v45  ;;  %795 = vmatpush.msrb.mxu3 %v2136_v42 }
 0x216   :  { %v527_v29 = vpop.f32.mrf.mxu0  ;;  %v547_v51 = vpop.f32.mrf.mxu1 }
 0x217   :  { %v590_v5 = vadd.f32 %v527_v29, %v2212_v0  ;;  %v591_v6 = vadd.f32 %v547_v51, %v2232_v16 }
 0x219   :  { %v594_v13 = vmul.f32 0.5, %v590_v5  ;;  %v595_v14 = vmul.f32 0.5, %v591_v6 }
 0x21b   :  { %1702 = vtanh.f32 %v594_v13 }
 0x21c   :  { %1704 = vtanh.f32 %v595_v14 }
 0x21d   :  { %v567_v17 = vpop.f32.mrf.mxu2  ;;  %v587_v23 = vpop.f32.mrf.mxu3 }
 0x21e   :  { %v592_v24 = vadd.f32 %v567_v17, %v2208_v58  ;;  %v593_v7 = vadd.f32 %v587_v23, %v2214_v1 }
 0x220   :  { %v596_v26 = vmul.f32 0.5, %v592_v24  ;;  %1706 = vtanh.f32 %v593_v7 }
 0x221   :  { %v1703_v61 = vpop.eup %1702 }
 0x222   :  { %v1705_v57 = vpop.eup %1704  ;;  %v600_v55 = vadd.f32 1.0, %v1703_v61  ;;  %1708 = vtanh.f32 %v596_v26 }
 0x223   :  { %v601_v28 = vadd.f32 1.0, %v1705_v57 }
 0x224   :  { %v603_v0 = vmul.f32 0.5, %v600_v55 }
 0x225   :  { %v604_v48 = vmul.f32 0.5, %v601_v28 }
 0x226   :  { %v1707_v16 = vpop.eup %1706 }
 0x227   :  { %v607_v52 = vmul.f32 %v604_v48, %v2246_v53  ;;  %v608_v56 = vmul.f32 %v1707_v16, %v603_v0 }
 0x228   :  { %v1709_v29 = vpop.eup %1708 }
 0x229   :  { %v2296_v51 = vadd.f32 %v608_v56, %v607_v52  ;;  %v602_v58 = vadd.f32 1.0, %v1709_v29 }
 0x22b   :  { %1710 = vtanh.f32 %v2296_v51  ;;  %v605_v1 = vmul.f32 0.5, %v602_v58 }
 0x231   :  { %v1711_v5 = vpop.eup %1710 }
 0x232   :  { %v2299_v6 = vmul.f32 %v1711_v5, %v605_v1 }
 0x234   :  { %1623 = vmatmul.msk.f32.vlgmr.msrb.gmra.mxu0 %vm401_vm1, %v2299_v6  ;;  %1624 = vmatmul.msk.f32.vlgmr.msrb.gmra.mxu1 %vm401_vm1, %v2299_v6 }
 0x235   :  { %1625 = vmatmul.msk.f32.vlgmr.msra.gmra.mxu2 %vm401_vm1, %v2299_v6  ;;  %1626 = vmatmul.msk.f32.vlgmr.msra.gmra.mxu3 %vm401_vm1, %v2299_v6 }
 0x236   :  { %833 = vmatpush.msrb.mxu0 %v1998_v9  ;;  %853 = vmatpush.msrb.mxu1 %v1916_v32 }
 0x237   :  { %873 = vmatpush.msra.mxu2 %v2000_v10  ;;  %893 = vmatpush.msra.mxu3 %v1987_v8 }
 0x238   :  { %834 = vmatpush.msrb.mxu0 %v2002_v11  ;;  %854 = vmatpush.msrb.mxu1 %v1919_v36 }
 0x239   :  { %874 = vmatpush.msra.mxu2 %v2031_v21  ;;  %894 = vmatpush.msra.mxu3 %v2019_v18 }
 0x23a   :  { %835 = vmatpush.msrb.mxu0 %v2011_v15  ;;  %855 = vmatpush.msrb.mxu1 %v1929_v44 }
 0x23b   :  { %875 = vmatpush.msra.mxu2 %v2060_v31  ;;  %895 = vmatpush.msra.mxu3 %v2049_v27 }
 0x23c   :  { %836 = vmatpush.msrb.mxu0 %v2022_v19  ;;  %856 = vmatpush.msrb.mxu1 %v1937_v46 }
 0x23d   :  { %876 = vmatpush.msra.mxu2 %v2073_v34  ;;  %896 = vmatpush.msra.mxu3 %v2068_v33 }
 0x23e   :  { %837 = vmatpush.msrb.mxu0 %v2029_v20  ;;  %857 = vmatpush.msrb.mxu1 %v1942_v49 }
 0x23f   :  { %877 = vmatpush.msra.mxu2 %v2093_v37  ;;  %897 = vmatpush.msra.mxu3 %v2086_v35 }
 0x240   :  { %838 = vmatpush.msrb.mxu0 %v2033_v22  ;;  %858 = vmatpush.msrb.mxu1 %v1944_v50 }
 0x241   :  { %878 = vmatpush.msra.mxu2 %v2108_v40  ;;  %898 = vmatpush.msra.mxu3 %v2102_v39 }
 0x242   :  { %839 = vmatpush.msrb.mxu0 %v2042_v25  ;;  %859 = vmatpush.msrb.mxu1 %v1955_v59 }
 0x243   :  { %879 = vmatpush.msra.mxu2 %v2110_v41  ;;  %899 = vmatpush.msra.mxu3 %v2120_v43 }
 0x244   :  { %840 = vmatpush.msrb.mxu0 %v2052_v30  ;;  %860 = vmatpush.msrb.mxu1 %v1966_v60 }
 0x245   :  { %880 = vmatpush.msra.mxu2 %v2122_v45  ;;  %900 = vmatpush.msra.mxu3 %v2136_v42 }
 0x2b1   :  { %v632_v53 = vpop.f32.mrf.mxu0  ;;  %v652_v13 = vpop.f32.mrf.mxu1 }
 0x2b2   :  { %v695_v14 = vadd.f32 %v632_v53, %v2220_v4  ;;  %v696_v17 = vadd.f32 %v652_v13, %v2190_v47 }
 0x2b4   :  { %v699_v23 = vmul.f32 0.5, %v695_v14  ;;  %v700_v24 = vmul.f32 0.5, %v696_v17 }
 0x2b6   :  { %1712 = vtanh.f32 %v699_v23 }
 0x2b7   :  { %1714 = vtanh.f32 %v700_v24 }
 0x2b8   :  { %v672_v7 = vpop.f32.mrf.mxu2  ;;  %v692_v26 = vpop.f32.mrf.mxu3 }
 0x2b9   :  { %v697_v61 = vadd.f32 %v672_v7, %v2210_v63  ;;  %v698_v57 = vadd.f32 %v692_v26, %v2218_v3 }
 0x2bb   :  { %v701_v55 = vmul.f32 0.5, %v697_v61  ;;  %1716 = vtanh.f32 %v698_v57  ;;  %v2638_v57 = vld [vmem:[#allocation17_spill] sm:$0xff] }
 0x2bc   :  { %v1713_v28 = vpop.eup %1712 }
 0x2bd   :  { %v1715_v0 = vpop.eup %1714  ;;  %v705_v48 = vadd.f32 1.0, %v1713_v28  ;;  %1718 = vtanh.f32 %v701_v55 }
 0x2be   :  { %v706_v16 = vadd.f32 1.0, %v1715_v0 }
 0x2bf   :  { %v708_v4 = vmul.f32 0.5, %v705_v48 }
 0x2c0   :  { %v709_v52 = vmul.f32 0.5, %v706_v16 }
 0x2c1   :  { %v1717_v47 = vpop.eup %1716 }
 0x2c2   :  { %v712_v56 = vmul.f32 %v709_v52, %v2296_v51  ;;  %v713_v29 = vmul.f32 %v1717_v47, %v708_v4 }
 0x2c3   :  { %v1719_v58 = vpop.eup %1718 }
 0x2c4   :  { %v2346_v1 = vadd.f32 %v713_v29, %v712_v56  ;;  %v707_v63 = vadd.f32 1.0, %v1719_v58 }
 0x2c6   :  { %1720 = vtanh.f32 %v2346_v1  ;;  %v710_v3 = vmul.f32 0.5, %v707_v63 }
 0x2cc   :  { %v1721_v5 = vpop.eup %1720 }
 0x2cd   :  { %v2349_v53 = vmul.f32 %v1721_v5, %v710_v3 }
 0x2cf   :  { %1627 = vmatmul.msk.f32.vlgmr.msra.gmra.mxu0 %vm401_vm1, %v2349_v53  ;;  %1628 = vmatmul.msk.f32.vlgmr.msra.gmra.mxu1 %vm401_vm1, %v2349_v53 }
 0x2d0   :  { %1629 = vmatmul.msk.f32.vlgmr.msrb.gmra.mxu2 %vm401_vm1, %v2349_v53  ;;  %1630 = vmatmul.msk.f32.vlgmr.msrb.gmra.mxu3 %vm401_vm1, %v2349_v53 }
 0x2d1   :  { %938 = vmatpush.msra.mxu0 %v1998_v9  ;;  %958 = vmatpush.msra.mxu1 %v1916_v32 }
 0x2d2   :  { %978 = vmatpush.msrb.mxu2 %v2000_v10  ;;  %998 = vmatpush.msrb.mxu3 %v1987_v8 }
 0x2d3   :  { %939 = vmatpush.msra.mxu0 %v2002_v11  ;;  %959 = vmatpush.msra.mxu1 %v1919_v36 }
 0x2d4   :  { %979 = vmatpush.msrb.mxu2 %v2031_v21  ;;  %999 = vmatpush.msrb.mxu3 %v2019_v18 }
 0x2d5   :  { %940 = vmatpush.msra.mxu0 %v2011_v15  ;;  %960 = vmatpush.msra.mxu1 %v1929_v44 }
 0x2d6   :  { %980 = vmatpush.msrb.mxu2 %v2060_v31  ;;  %1000 = vmatpush.msrb.mxu3 %v2049_v27 }
 0x2d7   :  { %941 = vmatpush.msra.mxu0 %v2022_v19  ;;  %961 = vmatpush.msra.mxu1 %v1937_v46 }
 0x2d8   :  { %981 = vmatpush.msrb.mxu2 %v2073_v34  ;;  %1001 = vmatpush.msrb.mxu3 %v2068_v33 }
 0x2d9   :  { %942 = vmatpush.msra.mxu0 %v2029_v20  ;;  %962 = vmatpush.msra.mxu1 %v1942_v49 }
 0x2da   :  { %982 = vmatpush.msrb.mxu2 %v2093_v37  ;;  %1002 = vmatpush.msrb.mxu3 %v2086_v35 }
 0x2db   :  { %943 = vmatpush.msra.mxu0 %v2033_v22  ;;  %963 = vmatpush.msra.mxu1 %v1944_v50 }
 0x2dc   :  { %983 = vmatpush.msrb.mxu2 %v2108_v40  ;;  %1003 = vmatpush.msrb.mxu3 %v2102_v39 }
 0x2dd   :  { %944 = vmatpush.msra.mxu0 %v2042_v25  ;;  %964 = vmatpush.msra.mxu1 %v1955_v59 }
 0x2de   :  { %984 = vmatpush.msrb.mxu2 %v2110_v41  ;;  %1004 = vmatpush.msrb.mxu3 %v2120_v43 }
 0x2df   :  { %945 = vmatpush.msra.mxu0 %v2052_v30  ;;  %965 = vmatpush.msra.mxu1 %v1966_v60 }
 0x2e0   :  { %985 = vmatpush.msrb.mxu2 %v2122_v45  ;;  %1005 = vmatpush.msrb.mxu3 %v2136_v42 }
 0x34c   :  { %v737_v51 = vpop.f32.mrf.mxu0  ;;  %v757_v13 = vpop.f32.mrf.mxu1 }
 0x34d   :  { %v800_v14 = vadd.f32 %v737_v51, %v2226_v12  ;;  %v801_v17 = vadd.f32 %v757_v13, %v2192_v38 }
 0x34f   :  { %v804_v23 = vmul.f32 0.5, %v800_v14  ;;  %v805_v24 = vmul.f32 0.5, %v801_v17  ;;  %v2641_v14 = vld [vmem:[#allocation16_spill] sm:$0xff] }
 0x351   :  { %1722 = vtanh.f32 %v804_v23  ;;  %v2642_v23 = vld [vmem:[#allocation19_spill] sm:$0xff] }
 0x352   :  { %1724 = vtanh.f32 %v805_v24 }
 0x353   :  { %v777_v7 = vpop.f32.mrf.mxu2  ;;  %v797_v26 = vpop.f32.mrf.mxu3 }
 0x354   :  { %v802_v61 = vadd.f32 %v777_v7, %v2216_v2  ;;  %v803_v55 = vadd.f32 %v797_v26, %v2638_v57 }
 0x356   :  { %v806_v28 = vmul.f32 0.5, %v802_v61  ;;  %1726 = vtanh.f32 %v803_v55 }
 0x357   :  { %v1723_v0 = vpop.eup %1722 }
 0x358   :  { %v1725_v48 = vpop.eup %1724  ;;  %v810_v16 = vadd.f32 1.0, %v1723_v0  ;;  %1728 = vtanh.f32 %v806_v28 }
 0x359   :  { %v811_v4 = vadd.f32 1.0, %v1725_v48 }
 0x35a   :  { %v813_v12 = vmul.f32 0.5, %v810_v16 }
 0x35b   :  { %v814_v52 = vmul.f32 0.5, %v811_v4 }
 0x35c   :  { %v1727_v38 = vpop.eup %1726 }
 0x35d   :  { %v817_v47 = vmul.f32 %v814_v52, %v2346_v1  ;;  %v818_v56 = vmul.f32 %v1727_v38, %v813_v12 }
 0x35e   :  { %v1729_v29 = vpop.eup %1728 }
 0x35f   :  { %v2396_v58 = vadd.f32 %v818_v56, %v817_v47  ;;  %v812_v2 = vadd.f32 1.0, %v1729_v29  ;;  %v1790_v29 = vld [vmem:[#allocation2 + $0x188] sm:$0xff] }
 0x361   :  { %1730 = vtanh.f32 %v2396_v58  ;;  %v815_v63 = vmul.f32 0.5, %v812_v2  ;;  %v1792_v2 = vld [vmem:[#allocation2 + $0x148] sm:$0xff] }
 0x367   :  { %v1731_v3 = vpop.eup %1730 }
 0x368   :  { %v2399_v5 = vmul.f32 %v1731_v3, %v815_v63 }
 0x36a   :  { %1631 = vmatmul.msk.f32.vlgmr.msrb.gmra.mxu0 %vm401_vm1, %v2399_v5  ;;  %1632 = vmatmul.msk.f32.vlgmr.msrb.gmra.mxu1 %vm401_vm1, %v2399_v5 }
 0x36b   :  { %1633 = vmatmul.msk.f32.vlgmr.msra.gmra.mxu2 %vm401_vm1, %v2399_v5  ;;  %1634 = vmatmul.msk.f32.vlgmr.msra.gmra.mxu3 %vm401_vm1, %v2399_v5 }
 0x36c   :  { %1043 = vmatpush.msrb.mxu0 %v1998_v9  ;;  %1063 = vmatpush.msrb.mxu1 %v1916_v32 }
 0x36d   :  { %1083 = vmatpush.msra.mxu2 %v2000_v10  ;;  %1103 = vmatpush.msra.mxu3 %v1987_v8 }
 0x36e   :  { %1044 = vmatpush.msrb.mxu0 %v2002_v11  ;;  %1064 = vmatpush.msrb.mxu1 %v1919_v36 }
 0x36f   :  { %1084 = vmatpush.msra.mxu2 %v2031_v21  ;;  %1104 = vmatpush.msra.mxu3 %v2019_v18 }
 0x370   :  { %1045 = vmatpush.msrb.mxu0 %v2011_v15  ;;  %1065 = vmatpush.msrb.mxu1 %v1929_v44  ;;  %v2639_v44 = vld [vmem:[#allocation20_spill] sm:$0xff] }
 0x371   :  { %1085 = vmatpush.msra.mxu2 %v2060_v31  ;;  %1105 = vmatpush.msra.mxu3 %v2049_v27 }
 0x372   :  { %1046 = vmatpush.msrb.mxu0 %v2022_v19  ;;  %1066 = vmatpush.msrb.mxu1 %v1937_v46 }
 0x373   :  { %1086 = vmatpush.msra.mxu2 %v2073_v34  ;;  %1106 = vmatpush.msra.mxu3 %v2068_v33 }
 0x374   :  { %1047 = vmatpush.msrb.mxu0 %v2029_v20  ;;  %1067 = vmatpush.msrb.mxu1 %v1942_v49  ;;  %v2640_v49 = vld [vmem:[#allocation10_spill] sm:$0xff] }
 0x375   :  { %1087 = vmatpush.msra.mxu2 %v2093_v37  ;;  %1107 = vmatpush.msra.mxu3 %v2086_v35 }
 0x376   :  { %1048 = vmatpush.msrb.mxu0 %v2033_v22  ;;  %1068 = vmatpush.msrb.mxu1 %v1944_v50 }
 0x377   :  { %1088 = vmatpush.msra.mxu2 %v2108_v40  ;;  %1108 = vmatpush.msra.mxu3 %v2102_v39 }
 0x378   :  { %1049 = vmatpush.msrb.mxu0 %v2042_v25  ;;  %1069 = vmatpush.msrb.mxu1 %v1955_v59 }
 0x379   :  { %1089 = vmatpush.msra.mxu2 %v2110_v41  ;;  %1109 = vmatpush.msra.mxu3 %v2120_v43 }
 0x37a   :  { %1050 = vmatpush.msrb.mxu0 %v2052_v30  ;;  %1070 = vmatpush.msrb.mxu1 %v1966_v60 }
 0x37b   :  { %1090 = vmatpush.msra.mxu2 %v2122_v45  ;;  %1110 = vmatpush.msra.mxu3 %v2136_v42 }
 0x3e7   :  { %v842_v32 = vpop.f32.mrf.mxu0  ;;  %v862_v36 = vpop.f32.mrf.mxu1 }
 0x3e8   :  { %v905_v46 = vadd.f32 %v842_v32, %v2639_v44  ;;  %v906_v50 = vadd.f32 %v862_v36, %v2640_v49 }
 0x3ea   :  { %v909_v1 = vmul.f32 0.5, %v905_v46  ;;  %v910_v59 = vmul.f32 0.5, %v906_v50 }
 0x3ec   :  { %1732 = vtanh.f32 %v909_v1 }
 0x3ed   :  { %1734 = vtanh.f32 %v910_v59 }
 0x3ee   :  { %v882_v51 = vpop.f32.mrf.mxu2  ;;  %v902_v13 = vpop.f32.mrf.mxu3 }
 0x3ef   :  { %v907_v17 = vadd.f32 %v882_v51, %v2641_v14  ;;  %v908_v60 = vadd.f32 %v902_v13, %v2642_v23 }
 0x3f1   :  { %v911_v24 = vmul.f32 0.5, %v907_v17  ;;  %1736 = vtanh.f32 %v908_v60  ;;  %v2647_v17 = vld [vmem:[#allocation11_spill] sm:$0xff]  ;;  %v2648_v60 = vld [vmem:[#allocation14_spill] sm:$0xff] }
 0x3f2   :  { %v1733_v7 = vpop.eup %1732 }
 0x3f3   :  { %v1735_v26 = vpop.eup %1734  ;;  %v915_v61 = vadd.f32 1.0, %v1733_v7  ;;  %1738 = vtanh.f32 %v911_v24 }
 0x3f4   :  { %v916_v57 = vadd.f32 1.0, %v1735_v26 }
 0x3f5   :  { %v918_v55 = vmul.f32 0.5, %v915_v61 }
 0x3f6   :  { %v919_v28 = vmul.f32 0.5, %v916_v57 }
 0x3f7   :  { %v1737_v0 = vpop.eup %1736 }
 0x3f8   :  { %v922_v48 = vmul.f32 %v919_v28, %v2396_v58  ;;  %v923_v16 = vmul.f32 %v1737_v0, %v918_v55  ;;  %v1791_v58 = vld [vmem:[#allocation2 + $0x168] sm:$0xff]  ;;  %v2649_v55 = vld [vmem:[#allocation21_spill] sm:$0xff] }
 0x3f9   :  { %v1739_v4 = vpop.eup %1738  ;;  %v2650_v0 = vld [vmem:[#allocation23_spill] sm:$0xff] }
 0x3fa   :  { %v2446_v12 = vadd.f32 %v923_v16, %v922_v48  ;;  %v917_v52 = vadd.f32 1.0, %v1739_v4 }
 0x3fc   :  { %1740 = vtanh.f32 %v2446_v12  ;;  %v920_v38 = vmul.f32 0.5, %v917_v52 }
 0x402   :  { %v1741_v47 = vpop.eup %1740 }
 0x403   :  { %v2449_v56 = vmul.f32 %v1741_v47, %v920_v38 }
 0x405   :  { %1635 = vmatmul.msk.f32.vlgmr.msra.gmra.mxu0 %vm401_vm1, %v2449_v56  ;;  %1636 = vmatmul.msk.f32.vlgmr.msra.gmra.mxu1 %vm401_vm1, %v2449_v56 }
 0x406   :  { %1637 = vmatmul.msk.f32.vlgmr.msrb.gmra.mxu2 %vm401_vm1, %v2449_v56  ;;  %1638 = vmatmul.msk.f32.vlgmr.msrb.gmra.mxu3 %vm401_vm1, %v2449_v56 }
 0x407   :  { %1148 = vmatpush.msra.mxu0 %v1998_v9  ;;  %1168 = vmatpush.msra.mxu1 %v1790_v29  ;;  %v1793_v9 = vld [vmem:[#allocation2 + $0x128] sm:$0xff] }
 0x408   :  { %1188 = vmatpush.msrb.mxu2 %v2000_v10  ;;  %1208 = vmatpush.msrb.mxu3 %v1987_v8  ;;  %v1794_v8 = vld [vmem:[#allocation2 + $0x108] sm:$0xff] }
 0x409   :  { %1149 = vmatpush.msra.mxu0 %v2002_v11  ;;  %1169 = vmatpush.msra.mxu1 %v1791_v58  ;;  %v1795_v10 = vld [vmem:[#allocation2 + $0xe8] sm:$0xff] }
 0x40a   :  { %1189 = vmatpush.msrb.mxu2 %v2031_v21  ;;  %1209 = vmatpush.msrb.mxu3 %v2019_v18  ;;  %v1796_v11 = vld [vmem:[#allocation2 + $0xc8] sm:$0xff] }
 0x40b   :  { %1150 = vmatpush.msra.mxu0 %v2011_v15  ;;  %1170 = vmatpush.msra.mxu1 %v1792_v2  ;;  %v1797_v15 = vld [vmem:[#allocation2 + $0xa8] sm:$0xff] }
 0x40c   :  { %1190 = vmatpush.msrb.mxu2 %v2060_v31  ;;  %1210 = vmatpush.msrb.mxu3 %v2049_v27 }
 0x40d   :  { %1151 = vmatpush.msra.mxu0 %v2022_v19  ;;  %1171 = vmatpush.msra.mxu1 %v1793_v9 }
 0x40e   :  { %1191 = vmatpush.msrb.mxu2 %v2073_v34  ;;  %1211 = vmatpush.msrb.mxu3 %v2068_v33 }
 0x40f   :  { %1152 = vmatpush.msra.mxu0 %v2029_v20  ;;  %1172 = vmatpush.msra.mxu1 %v1794_v8  ;;  %v2643_v20 = vld [vmem:[#allocation9_spill] sm:$0xff] }
 0x410   :  { %1192 = vmatpush.msrb.mxu2 %v2093_v37  ;;  %1212 = vmatpush.msrb.mxu3 %v2086_v35  ;;  %v2645_v35 = vld [vmem:[#allocation18_spill] sm:$0xff] }
 0x411   :  { %1153 = vmatpush.msra.mxu0 %v2033_v22  ;;  %1173 = vmatpush.msra.mxu1 %v1795_v10  ;;  %v2644_v22 = vld [vmem:[#allocation12_spill] sm:$0xff]  ;;  %v2646_v37 = vld [vmem:[#allocation22_spill] sm:$0xff] }
 0x412   :  { %1193 = vmatpush.msrb.mxu2 %v2108_v40  ;;  %1213 = vmatpush.msrb.mxu3 %v2102_v39 }
 0x413   :  { %1154 = vmatpush.msra.mxu0 %v2042_v25  ;;  %1174 = vmatpush.msra.mxu1 %v1796_v11 }
 0x414   :  { %1194 = vmatpush.msrb.mxu2 %v2110_v41  ;;  %1214 = vmatpush.msrb.mxu3 %v2120_v43 }
 0x415   :  { %1155 = vmatpush.msra.mxu0 %v2052_v30  ;;  %1175 = vmatpush.msra.mxu1 %v1797_v15 }
 0x416   :  { %1195 = vmatpush.msrb.mxu2 %v2122_v45  ;;  %1215 = vmatpush.msrb.mxu3 %v2136_v42 }
 0x482   :  { %v947_v18 = vpop.f32.mrf.mxu0  ;;  %v967_v19 = vpop.f32.mrf.mxu1 }
 0x483   :  { %v1010_v21 = vadd.f32 %v947_v18, %v2643_v20  ;;  %v1011_v25 = vadd.f32 %v967_v19, %v2644_v22  ;;  %v1258_v20 = vld [vmem:[#allocation4 + $0x38] sm:$0xff]  ;;  %v1256_v22 = vld [vmem:[#allocation4 + $0x28] sm:$0xff] }
 0x485   :  { %v1014_v27 = vmul.f32 0.5, %v1010_v21  ;;  %v1015_v31 = vmul.f32 0.5, %v1011_v25  ;;  %v1257_v21 = vld [vmem:[#allocation4 + $0x30] sm:$0xff]  ;;  %v1255_v25 = vld [vmem:[#allocation4 + $0x20] sm:$0xff] }
 0x487   :  { %1742 = vtanh.f32 %v1014_v27  ;;  %v1254_v27 = vld [vmem:[#allocation4 + $0x18] sm:$0xff] }
 0x488   :  { %1744 = vtanh.f32 %v1015_v31  ;;  %v1253_v31 = vld [vmem:[#allocation4 + $0x10] sm:$0xff] }
 0x489   :  { %v987_v33 = vpop.f32.mrf.mxu2  ;;  %v1007_v34 = vpop.f32.mrf.mxu3 }
 0x48a   :  { %v1012_v30 = vadd.f32 %v987_v33, %v2645_v35  ;;  %v1013_v39 = vadd.f32 %v1007_v34, %v2646_v37  ;;  %v1252_v33 = vld [vmem:[#allocation4 + $0x8] sm:$0xff]  ;;  %v1251_v34 = vld [vmem:[#allocation4] sm:$0xff]  ;;  %v2651_v37 = vld [vmem:[#allocation13_spill] sm:$0xff] }
 0x48c   :  { %v1016_v40 = vmul.f32 0.5, %v1012_v30  ;;  %1746 = vtanh.f32 %v1013_v39 }
 0x48d   :  { %v1743_v41 = vpop.eup %1742 }
 0x48e   :  { %v1745_v43 = vpop.eup %1744  ;;  %v1020_v45 = vadd.f32 1.0, %v1743_v41  ;;  %1748 = vtanh.f32 %v1016_v40  ;;  %v2652_v40 = vld [vmem:[#allocation15_spill] sm:$0xff] }
 0x48f   :  { %v1021_v42 = vadd.f32 1.0, %v1745_v43 }
 0x490   :  { %v1023_v63 = vmul.f32 0.5, %v1020_v45 }
 0x491   :  { %v1024_v3 = vmul.f32 0.5, %v1021_v42 }
 0x492   :  { %v1747_v32 = vpop.eup %1746 }
 0x493   :  { %v1027_v36 = vmul.f32 %v1024_v3, %v2446_v12  ;;  %v1028_v44 = vmul.f32 %v1747_v32, %v1023_v63  ;;  %v2653_v32 = vld [vmem:[#allocation24_spill] sm:$0xff] }
 0x494   :  { %v1749_v46 = vpop.eup %1748 }
 0x495   :  { %v1029_v49 = vadd.f32 %v1028_v44, %v1027_v36  ;;  %v1022_v50 = vadd.f32 1.0, %v1749_v46 }
 0x497   :  { %1750 = vtanh.f32 %v1029_v49  ;;  %v1025_v1 = vmul.f32 0.5, %v1022_v50 }
 0x49d   :  { %v1751_v59 = vpop.eup %1750 }
 0x49e   :  { %v2488_v51 = vmul.f32 %v1751_v59, %v1025_v1 }
 0x4a0   :  { %1639 = vmatmul.msk.f32.vlgmr.msrb.gmra.mxu0 %vm401_vm1, %v2488_v51  ;;  %1640 = vmatmul.msk.f32.vlgmr.msrb.gmra.mxu1 %vm401_vm1, %v2488_v51 }
 0x4a1   :  { %1641 = vmatmul.msk.f32.vlgmr.msra.gmra.mxu2 %vm401_vm1, %v2488_v51  ;;  %1642 = vmatmul.msk.f32.vlgmr.msra.gmra.mxu3 %vm401_vm1, %v2488_v51 }
 0x4a2   :  { %1309 = vmatpush.msrb.mxu0 %v1258_v20  ;;  %v1260_v20 = vld [vmem:[#allocation4 + $0x48] sm:$0xff] }
 0x4a4   :  { %1310 = vmatpush.msrb.mxu0 %v1257_v21 }
 0x4a6   :  { %1311 = vmatpush.msrb.mxu0 %v1256_v22 }
 0x4a8   :  { %1312 = vmatpush.msrb.mxu0 %v1255_v25 }
 0x4aa   :  { %1313 = vmatpush.msrb.mxu0 %v1254_v27 }
 0x4ac   :  { %1314 = vmatpush.msrb.mxu0 %v1253_v31 }
 0x4ae   :  { %1315 = vmatpush.msrb.mxu0 %v1252_v33 }
 0x4b0   :  { %1316 = vmatpush.msrb.mxu0 %v1251_v34 }
 0x51d   :  { %v1052_v13 = vpop.f32.mrf.mxu0  ;;  %v1072_v14 = vpop.f32.mrf.mxu1 }
 0x51e   :  { %v1115_v23 = vadd.f32 %v1052_v13, %v2647_v17  ;;  %v1116_v24 = vadd.f32 %v1072_v14, %v2648_v60 }
 0x520   :  { %v1119_v7 = vmul.f32 0.5, %v1115_v23  ;;  %v1120_v26 = vmul.f32 0.5, %v1116_v24 }
 0x522   :  { %1752 = vtanh.f32 %v1119_v7 }
 0x523   :  { %1754 = vtanh.f32 %v1120_v26 }
 0x524   :  { %v1092_v61 = vpop.f32.mrf.mxu2  ;;  %v1112_v57 = vpop.f32.mrf.mxu3 }
 0x525   :  { %v1117_v28 = vadd.f32 %v1092_v61, %v2649_v55  ;;  %v1118_v48 = vadd.f32 %v1112_v57, %v2650_v0  ;;  %v2654_v57 = vld [vmem:[#allocation8_spill] sm:$0xff] }
 0x526   :  { %vm1242_vm2 = vcmp.lt.s32.totalorder %v2654_v57, 32 }
 0x527   :  { %v1121_v16 = vmul.f32 0.5, %v1117_v28  ;;  %1756 = vtanh.f32 %v1118_v48  ;;  %v2536_v0 = vsel %vm1242_vm2, %v2349_v53, %v2488_v51  ;;  %v2544_v48 = vsel %vm1242_vm2, %v2399_v5, %v2449_v56 }
 0x528   :  { %v1753_v4 = vpop.eup %1752 }
 0x529   :  { %v1755_v12 = vpop.eup %1754  ;;  %v1125_v52 = vadd.f32 1.0, %v1753_v4  ;;  %1758 = vtanh.f32 %v1121_v16  ;;  %v1275_v16 = vld [vmem:[#allocation4 + $0xc0] sm:$0xff]  ;;  %v1274_v4 = vld [vmem:[#allocation4 + $0xb8] sm:$0xff] }
 0x52a   :  { %v1126_v38 = vadd.f32 1.0, %v1755_v12  ;;  %1350 = vmatpush.msrb.mxu1 %v1275_v16  ;;  %v1273_v12 = vld [vmem:[#allocation4 + $0xb0] sm:$0xff] }
 0x52b   :  { %v1128_v47 = vmul.f32 0.5, %v1125_v52  ;;  %v1272_v52 = vld [vmem:[#allocation4 + $0xa8] sm:$0xff] }
 0x52c   :  { %v1129_v29 = vmul.f32 0.5, %v1126_v38  ;;  %1351 = vmatpush.msrb.mxu1 %v1274_v4  ;;  %v1271_v38 = vld [vmem:[#allocation4 + $0xa0] sm:$0xff] }
 0x52d   :  { %v1757_v58 = vpop.eup %1756 }
 0x52e   :  { %v1132_v2 = vmul.f32 %v1129_v29, %v1029_v49  ;;  %v1133_v9 = vmul.f32 %v1757_v58, %v1128_v47  ;;  %1352 = vmatpush.msrb.mxu1 %v1273_v12  ;;  %v2552_v47 = vsel %vm1242_vm2, %v2449_v56, %v2399_v5  ;;  %v1270_v29 = vld [vmem:[#allocation4 + $0x98] sm:$0xff]  ;;  %v1269_v58 = vld [vmem:[#allocation4 + $0x90] sm:$0xff] }
 0x52f   :  { %v1759_v8 = vpop.eup %1758  ;;  %v1266_v5 = vld [vmem:[#allocation4 + $0x78] sm:$0xff]  ;;  %v1265_v56 = vld [vmem:[#allocation4 + $0x70] sm:$0xff] }
 0x530   :  { %v1134_v10 = vadd.f32 %v1133_v9, %v1132_v2  ;;  %v1127_v11 = vadd.f32 1.0, %v1759_v8  ;;  %1353 = vmatpush.msrb.mxu1 %v1272_v52  ;;  %v1268_v2 = vld [vmem:[#allocation4 + $0x88] sm:$0xff]  ;;  %v1267_v9 = vld [vmem:[#allocation4 + $0x80] sm:$0xff]  ;;  %v2560_v8 = vsel %vm1242_vm2, %v2488_v51, %v2349_v53  ;;  %v1262_v51 = vld [vmem:[#allocation4 + $0x58] sm:$0xff] }
 0x532   :  { %1760 = vtanh.f32 %v1134_v10  ;;  %v1130_v15 = vmul.f32 0.5, %v1127_v11  ;;  %1354 = vmatpush.msrb.mxu1 %v1271_v38  ;;  %v1263_v11 = vld [vmem:[#allocation4 + $0x60] sm:$0xff] }
 0x534   :  { %1355 = vmatpush.msrb.mxu1 %v1270_v29 }
 0x536   :  { %1356 = vmatpush.msrb.mxu1 %v1269_v58 }
 0x538   :  { %v1761_v18 = vpop.eup %1760  ;;  %1357 = vmatpush.msrb.mxu1 %v1268_v2 }
 0x539   :  { %v2502_v19 = vmul.f32 %v1761_v18, %v1130_v15  ;;  %v1261_v18 = vld [vmem:[#allocation4 + $0x50] sm:$0xff] }
 0x53a   :  { %1358 = vmatpush.msrb.mxu1 %v1267_v9 }
 0x53b   :  { %1643 = vmatmul.msk.f32.vlgmr.msra.gmra.mxu0 %vm401_vm1, %v2502_v19  ;;  %1644 = vmatmul.msk.f32.vlgmr.msra.gmra.mxu1 %vm401_vm1, %v2502_v19  ;;  %v2528_v28 = vsel %vm1242_vm2, %v2299_v6, %v2502_v19  ;;  %v2568_v15 = vsel %vm1242_vm2, %v2502_v19, %v2299_v6  ;;  %v1690_v6 = vld [vmem:[#allocation4 + $0x40] ss:$0 sm:$0xff] }
 0x53c   :  { %1645 = vmatmul.msk.f32.vlgmr.msrb.gmra.mxu2 %vm401_vm1, %v2502_v19  ;;  %1646 = vmatmul.msk.f32.vlgmr.msrb.gmra.mxu3 %vm401_vm1, %v2502_v19 }
 0x53d   :  { %1359 = vmatpush.msrb.mxu1 %v1266_v5 }
 0x53f   :  { %1360 = vmatpush.msrb.mxu1 %v1265_v56 }
 0x5b8   :  { %v1157_v35 = vpop.f32.mrf.mxu0  ;;  %v1177_v30 = vpop.f32.mrf.mxu1 }
 0x5b9   :  { %v1220_v39 = vadd.f32 %v1157_v35, %v2651_v37  ;;  %v1221_v41 = vadd.f32 %v1177_v30, %v2652_v40 }
 0x5bb   :  { %v1224_v43 = vmul.f32 0.5, %v1220_v39  ;;  %v1225_v45 = vmul.f32 0.5, %v1221_v41 }
 0x5bd   :  { %1762 = vtanh.f32 %v1224_v43 }
 0x5be   :  { %1764 = vtanh.f32 %v1225_v45 }
 0x5bf   :  { %v1197_v42 = vpop.f32.mrf.mxu2  ;;  %v1217_v63 = vpop.f32.mrf.mxu3 }
 0x5c0   :  { %v1222_v3 = vadd.f32 %v1197_v42, %v2242_v54  ;;  %v1223_v36 = vadd.f32 %v1217_v63, %v2653_v32 }
 0x5c2   :  { %v1226_v44 = vmul.f32 0.5, %v1222_v3  ;;  %1766 = vtanh.f32 %v1223_v36 }
 0x5c3   :  { %v1763_v46 = vpop.eup %1762 }
 0x5c4   :  { %v1765_v49 = vpop.eup %1764  ;;  %v1230_v50 = vadd.f32 1.0, %v1763_v46  ;;  %1768 = vtanh.f32 %v1226_v44 }
 0x5c5   :  { %v1231_v1 = vadd.f32 1.0, %v1765_v49 }
 0x5c6   :  { %v1233_v59 = vmul.f32 0.5, %v1230_v50 }
 0x5c7   :  { %v1234_v13 = vmul.f32 0.5, %v1231_v1 }
 0x5c8   :  { %v1767_v14 = vpop.eup %1766 }
 0x5c9   :  { %v1237_v17 = vmul.f32 %v1234_v13, %v1134_v10  ;;  %v1238_v23 = vmul.f32 %v1767_v14, %v1233_v59  ;;  %v1264_v10 = vld [vmem:[#allocation4 + $0x68] sm:$0xff] }
 0x5ca   :  { %v1769_v60 = vpop.eup %1768  ;;  %1361 = vmatpush.msrb.mxu1 %v1264_v10 }
 0x5cb   :  { %v1239_v24 = vadd.f32 %v1238_v23, %v1237_v17  ;;  %v1232_v7 = vadd.f32 1.0, %v1769_v60 }
 0x5cc   :  { %1362 = vmatpush.msrb.mxu1 %v1263_v11 }
 0x5cd   :  { %1770 = vtanh.f32 %v1239_v24  ;;  %v1235_v26 = vmul.f32 0.5, %v1232_v7 }
 0x5ce   :  { %1363 = vmatpush.msrb.mxu1 %v1262_v51 }
 0x5d0   :  { %1364 = vmatpush.msrb.mxu1 %v1261_v18 }
 0x5d2   :  { %1365 = vmatpush.msrb.mxu1 %v1260_v20 }
 0x5d3   :  { %v1771_v54 = vpop.eup %1770 }
 0x5d4   :  { %v1241_v61 = vmul.f32 %v1771_v54, %v1235_v26 }
 0x5d6   :  { %v2520_v55 = vsel %vm1242_vm2, %v2249_v62, %v1241_v61  ;;  %v2575_v53 = vsel %vm1242_vm2, %v1241_v61, %v2249_v62 }
 0x5d7   :  { %1647 = vmatmul.msk.f32.vlgmr.msrb.gmra.mxu0 %vm401_vm1, %v2520_v55 }
 0x5df   :  { %1648 = vmatmul.msk.f32.gmra.mxu0 %vm401_vm1, %v2528_v28 }
 0x5e7   :  { %1649 = vmatmul.msk.f32.gmra.mxu0 %vm401_vm1, %v2536_v0 }
 0x5ef   :  { %1650 = vmatmul.msk.f32.gmra.mxu0 %vm401_vm1, %v2544_v48 }
 0x5f7   :  { %1651 = vmatmul.msk.f32.gmra.mxu0 %vm401_vm1, %v2552_v47 }
 0x5ff   :  { %1652 = vmatmul.msk.f32.gmra.mxu0 %vm401_vm1, %v2560_v8 }
 0x607   :  { %1653 = vmatmul.msk.f32.gmra.mxu0 %vm401_vm1, %v2568_v15 }
 0x60f   :  { %1654 = vmatmul.msk.f32.gmra.mxu0 %vm401_vm1, %v2575_v53 }
 0x654   :  { %v1318_v19 = vpop.f32.mrf.mxu0 }
 0x655   :  { %v1319_v21 = vadd.f32 %v1690_v6, %v1318_v19 }
 0x657   :  { %v1342_v22 = vmax.f32 %v1319_v21, 0.0 }
 0x659   :  { %1366 = vmatmul.f32.vlgmr.msrb.gmra.mxu1 %v1342_v22 }
 0x65c   :  { %v1321_v25 = vpop.f32.mrf.mxu0 }
 0x65d   :  { %v1322_v27 = vadd.f32 %v1690_v6, %v1321_v25 }
 0x65f   :  { %v1343_v31 = vmax.f32 %v1322_v27, 0.0 }
 0x661   :  { %1369 = vmatmul.f32.gmra.mxu1 %v1343_v31 }
 0x664   :  { %v1324_v62 = vpop.f32.mrf.mxu0 }
 0x665   :  { %v1325_v33 = vadd.f32 %v1690_v6, %v1324_v62 }
 0x667   :  { %v1344_v34 = vmax.f32 %v1325_v33, 0.0 }
 0x669   :  { %1372 = vmatmul.f32.gmra.mxu1 %v1344_v34 }
 0x66c   :  { %v1327_v35 = vpop.f32.mrf.mxu0 }
 0x66d   :  { %v1328_v30 = vadd.f32 %v1690_v6, %v1327_v35 }
 0x66f   :  { %v1345_v37 = vmax.f32 %v1328_v30, 0.0 }
 0x671   :  { %1375 = vmatmul.f32.gmra.mxu1 %v1345_v37 }
 0x674   :  { %v1330_v39 = vpop.f32.mrf.mxu0 }
 0x675   :  { %v1331_v40 = vadd.f32 %v1690_v6, %v1330_v39 }
 0x677   :  { %v1346_v41 = vmax.f32 %v1331_v40, 0.0 }
 0x679   :  { %1378 = vmatmul.f32.gmra.mxu1 %v1346_v41 }
 0x67c   :  { %v1333_v43 = vpop.f32.mrf.mxu0 }
 0x67d   :  { %v1334_v45 = vadd.f32 %v1690_v6, %v1333_v43 }
 0x67f   :  { %v1347_v42 = vmax.f32 %v1334_v45, 0.0 }
 0x681   :  { %1381 = vmatmul.f32.gmra.mxu1 %v1347_v42 }
 0x684   :  { %v1336_v63 = vpop.f32.mrf.mxu0 }
 0x685   :  { %v1337_v3 = vadd.f32 %v1690_v6, %v1336_v63 }
 0x687   :  { %v1348_v32 = vmax.f32 %v1337_v3, 0.0 }
 0x689   :  { %1384 = vmatmul.f32.gmra.mxu1 %v1348_v32 }
 0x68c   :  { %v1339_v36 = vpop.f32.mrf.mxu0 }
 0x68d   :  { %v1340_v44 = vadd.f32 %v1690_v6, %v1339_v36 }
 0x68f   :  { %v1349_v46 = vmax.f32 %v1340_v44, 0.0 }
 0x691   :  { %1387 = vmatmul.f32.gmra.mxu1 %v1349_v46 }
 0x6d6   :  { %v1367_v49 = vpop.f32.mrf.mxu1 }
 0x6d7   :  { %v1392_v61 = vsel %vm1391_vm3, %v1367_v49, -inf }
 0x6de   :  { %v1370_v50 = vpop.f32.mrf.mxu1 }
 0x6df   :  { %v1393_v60 = vsel %vm1391_vm3, %v1370_v50, -inf }
 0x6e6   :  { %v1373_v1 = vpop.f32.mrf.mxu1 }
 0x6e7   :  { %v1394_v57 = vsel %vm1391_vm3, %v1373_v1, -inf }
 0x6ee   :  { %v1376_v59 = vpop.f32.mrf.mxu1 }
 0x6ef   :  { %v1395_v16 = vsel %vm1391_vm3, %v1376_v59, -inf }
 0x6f6   :  { %v1379_v13 = vpop.f32.mrf.mxu1 }
 0x6f7   :  { %v1396_v24 = vsel %vm1391_vm3, %v1379_v13, -inf }
 0x6f8   :  { %v1397_v12 = vmax.f32 %v1392_v61, %v1396_v24 }
 0x6fe   :  { %v1382_v14 = vpop.f32.mrf.mxu1 }
 0x6ff   :  { %v1398_v23 = vsel %vm1391_vm3, %v1382_v14, -inf }
 0x700   :  { %v1399_v26 = vmax.f32 %v1393_v60, %v1398_v23 }
 0x702   :  { %v1404_v29 = vmax.f32 %v1397_v12, %v1399_v26 }
 0x706   :  { %v1385_v17 = vpop.f32.mrf.mxu1 }
 0x707   :  { %v1400_v7 = vsel %vm1391_vm3, %v1385_v17, -inf }
 0x708   :  { %v1401_v52 = vmax.f32 %v1394_v57, %v1400_v7 }
 0x70e   :  { %v1388_v54 = vpop.f32.mrf.mxu1 }
 0x70f   :  { %v1402_v4 = vsel %vm1391_vm3, %v1388_v54, -inf }
 0x710   :  { %v1403_v38 = vmax.f32 %v1395_v16, %v1402_v4 }
 0x712   :  { %v1405_v58 = vmax.f32 %v1401_v52, %v1403_v38 }
 0x714   :  { %v1406_v2 = vmax.f32 %v1404_v29, %v1405_v58 }
 0x716   :  { %v1407_v9 = vsub.f32 %v1367_v49, %v1406_v2  ;;  %v1408_v5 = vsub.f32 %v1370_v50, %v1406_v2  ;;  %v1409_v56 = vsub.f32 %v1373_v1, %v1406_v2  ;;  %v1410_v10 = vsub.f32 %v1376_v59, %v1406_v2 }
 0x717   :  { %v1411_v11 = vsub.f32 %v1379_v13, %v1406_v2  ;;  %v1412_v6 = vsub.f32 %v1382_v14, %v1406_v2  ;;  %v1413_v21 = vsub.f32 %v1385_v17, %v1406_v2  ;;  %v1414_v25 = vsub.f32 %v1388_v54, %v1406_v2 }
 0x718   :  { %v1415_v51 = vmul.f32 1.442695, %v1407_v9  ;;  %v1417_v18 = vmul.f32 1.442695, %v1408_v5  ;;  %v1419_v20 = vmul.f32 1.442695, %v1409_v56 }
 0x719   :  { %v1421_v19 = vmul.f32 1.442695, %v1410_v10  ;;  %v1423_v22 = vmul.f32 1.442695, %v1411_v11  ;;  %v1425_v27 = vmul.f32 1.442695, %v1412_v6 }
 0x71a   :  { %1772 = vpow2.f32 %v1415_v51  ;;  %v1427_v31 = vmul.f32 1.442695, %v1413_v21  ;;  %v1429_v34 = vmul.f32 1.442695, %v1414_v25  ;;  %v1538_v5 = vld [vmem:[#allocation4 + $0x100] sm:$0xff]  ;;  %v1537_v56 = vld [vmem:[#allocation4 + $0xf8] sm:$0xff] }
 0x71b   :  { %1774 = vpow2.f32 %v1417_v18  ;;  %1552 = vmatpush.msra.mxu2 %v1538_v5  ;;  %v1536_v10 = vld [vmem:[#allocation4 + $0xf0] sm:$0xff]  ;;  %v1535_v11 = vld [vmem:[#allocation4 + $0xe8] sm:$0xff]  ;;  %v1534_v51 = vld [vmem:[#allocation4 + $0xe0] sm:$0xff] }
 0x71c   :  { %1776 = vpow2.f32 %v1419_v20  ;;  %v1533_v18 = vld [vmem:[#allocation4 + $0xd8] sm:$0xff]  ;;  %v1532_v20 = vld [vmem:[#allocation4 + $0xd0] sm:$0xff] }
 0x71d   :  { %1778 = vpow2.f32 %v1421_v19  ;;  %1553 = vmatpush.msra.mxu2 %v1537_v56  ;;  %v1531_v19 = vld [vmem:[#allocation4 + $0xc8] sm:$0xff] }
 0x71e   :  { %1780 = vpow2.f32 %v1423_v22 }
 0x71f   :  { %1782 = vpow2.f32 %v1425_v27  ;;  %1554 = vmatpush.msra.mxu2 %v1536_v10 }
 0x720   :  { %v1773_v62 = vpop.eup %1772  ;;  %1784 = vpow2.f32 %v1427_v31 }
 0x721   :  { %v1775_v33 = vpop.eup %1774  ;;  %v1431_v35 = vsel %vm1391_vm3, %v1773_v62, 0.0  ;;  %1786 = vpow2.f32 %v1429_v34  ;;  %1555 = vmatpush.msra.mxu2 %v1535_v11 }
 0x722   :  { %v1777_v30 = vpop.eup %1776  ;;  %v1432_v37 = vsel %vm1391_vm3, %v1775_v33, 0.0 }
 0x723   :  { %v1779_v39 = vpop.eup %1778  ;;  %v1433_v40 = vadd.f32 %v1432_v37, %v1431_v35  ;;  %v1434_v41 = vsel %vm1391_vm3, %v1777_v30, 0.0  ;;  %1556 = vmatpush.msra.mxu2 %v1534_v51 }
 0x724   :  { %v1781_v43 = vpop.eup %1780  ;;  %v1436_v42 = vsel %vm1391_vm3, %v1779_v39, 0.0 }
 0x725   :  { %v1435_v45 = vadd.f32 %v1434_v41, %v1433_v40  ;;  %v1783_v63 = vpop.eup %1782  ;;  %v1438_v32 = vsel %vm1391_vm3, %v1781_v43, 0.0  ;;  %1557 = vmatpush.msra.mxu2 %v1533_v18 }
 0x726   :  { %v1785_v36 = vpop.eup %1784  ;;  %v1440_v46 = vsel %vm1391_vm3, %v1783_v63, 0.0 }
 0x727   :  { %v1437_v3 = vadd.f32 %v1436_v42, %v1435_v45  ;;  %v1787_v49 = vpop.eup %1786  ;;  %v1442_v1 = vsel %vm1391_vm3, %v1785_v36, 0.0  ;;  %1558 = vmatpush.msra.mxu2 %v1532_v20 }
 0x728   :  { %v1444_v13 = vsel %vm1391_vm3, %v1787_v49, 0.0 }
 0x729   :  { %v1439_v44 = vadd.f32 %v1438_v32, %v1437_v3  ;;  %1559 = vmatpush.msra.mxu2 %v1531_v19 }
 0x72b   :  { %v1441_v50 = vadd.f32 %v1440_v46, %v1439_v44 }
 0x72d   :  { %v1443_v59 = vadd.f32 %v1442_v1, %v1441_v50  ;;  %v1691_v1 = vld [vmem:[#allocation4 + $0x108] ss:$0 sm:$0xff] }
 0x72f   :  { %v1445_v14 = vadd.f32 %v1444_v13, %v1443_v59 }
 0x731   :  { %1788 = vrcp.f32 %v1445_v14  ;;  %v1457_v24 = vand.u32 2147483648, %v1445_v14  ;;  %v1455_v26 = vand.u32 2147483647, %v1445_v14  ;;  %vm1451_vm5 = vweird.f32 %v1445_v14 }
 0x733   :  { %v1458_v61 = vor.u32 1.1754944e-38, %v1457_v24  ;;  %vm1456_vm7 = vcmp.eq.f32.partialorder %v1455_v26, 8.507059e+37 }
 0x737   :  { %v1789_v17 = vpop.eup %1788 }
 0x738   :  { %v1447_v23 = vmul.f32 %v1789_v17, %v1445_v14  ;;  %vm1452_vm4 = vweird.f32 %v1789_v17 }
 0x739   :  { %vm1453_vm6 = vmor %vm1451_vm5, %vm1452_vm4 }
 0x73a   :  { %v1448_v60 = vsub.f32 1.0, %v1447_v23 }
 0x73c   :  { %v1449_v7 = vmul.f32 %v1789_v17, %v1448_v60 }
 0x73e   :  { %v1450_v54 = vadd.f32 %v1789_v17, %v1449_v7 }
 0x740   :  { %v1454_v57 = vsel %vm1453_vm6, %v1789_v17, %v1450_v54 }
 0x741   :  { %v1459_v16 = vsel %vm1456_vm7, %v1458_v61, %v1454_v57 }
 0x742   :  { %v1462_v4 = vmul.f32 %v1777_v30, %v1459_v16  ;;  %v1461_v12 = vmul.f32 %v1775_v33, %v1459_v16  ;;  %v1460_v52 = vmul.f32 %v1773_v62, %v1459_v16  ;;  %v1467_v38 = vmul.f32 %v1787_v49, %v1459_v16 }
 0x743   :  { %v1464_v29 = vmul.f32 %v1781_v43, %v1459_v16  ;;  %v1463_v58 = vmul.f32 %v1779_v39, %v1459_v16  ;;  %v1466_v2 = vmul.f32 %v1785_v36, %v1459_v16  ;;  %v1465_v9 = vmul.f32 %v1783_v63, %v1459_v16 }
 0x744   :  { %1480 = vperm.xlu0 %1689, %v1462_v4   ;;  %1475 = vperm.xlu2 %1688, %v1461_v12  }
 0x745   :  { %1470 = vperm.xlu1 %1686, %v1460_v52  }
 0x74c   :  { %1505 = vperm.xlu0 %1689, %v1467_v38   ;;  %1490 = vperm.xlu2 %1688, %v1464_v29  }
 0x74d   :  { %1485 = vperm.xlu1 %1686, %v1463_v58  }
 0x754   :  { %1500 = vperm.xlu2 %1688, %v1466_v2  }
 0x755   :  { %1495 = vperm.xlu1 %1686, %v1465_v9  }
 0x79e   :  { %v1476_v6 = vpop.permute.xlu2 %1475 }
 0x79f   :  { %v1509_v25 = vmul.f32 %v1476_v6, %v2528_v28 }
 0x7a1   :  { %v1517_v33 = vsel %vm401_vm1, %v1509_v25, 0.0 }
 0x7a6   :  { %v1491_v27 = vpop.permute.xlu2 %1490 }
 0x7ae   :  { %v1501_v28 = vpop.permute.xlu2 %1500 }
 0x7af   :  { %v1514_v3 = vmul.f32 %v1501_v28, %v2568_v15 }
 0x7b1   :  { %v1527_v46 = vsel %vm401_vm1, %v1514_v3, 0.0 }
 0x7b6   :  { %v1481_v31 = vpop.permute.xlu0 %1480 }
 0x7b7   :  { %v1471_v21 = vpop.permute.xlu1 %1470  ;;  %v1510_v34 = vmul.f32 %v1481_v31, %v2536_v0 }
 0x7b8   :  { %v1508_v22 = vmul.f32 %v1471_v21, %v2520_v55  ;;  %v1512_v55 = vmul.f32 %v1491_v27, %v2552_v47 }
 0x7b9   :  { %v1519_v39 = vsel %vm401_vm1, %v1510_v34, 0.0 }
 0x7ba   :  { %v1516_v62 = vsel %vm401_vm1, %v1508_v22, 0.0  ;;  %v1523_v63 = vsel %vm401_vm1, %v1512_v55, 0.0 }
 0x7bb   :  { %v1518_v35 = vadd.f32 %v1517_v33, %v1516_v62 }
 0x7bd   :  { %v1520_v41 = vadd.f32 %v1519_v39, %v1518_v35 }
 0x7be   :  { %v1506_v45 = vpop.permute.xlu0 %1505 }
 0x7bf   :  { %v1486_v30 = vpop.permute.xlu1 %1485 }
 0x7c0   :  { %v1511_v37 = vmul.f32 %v1486_v30, %v2544_v48  ;;  %v1515_v48 = vmul.f32 %v1506_v45, %v2575_v53 }
 0x7c2   :  { %v1521_v40 = vsel %vm401_vm1, %v1511_v37, 0.0  ;;  %v1529_v47 = vsel %vm401_vm1, %v1515_v48, 0.0 }
 0x7c3   :  { %v1522_v43 = vadd.f32 %v1521_v40, %v1520_v41 }
 0x7c5   :  { %v1524_v32 = vadd.f32 %v1523_v63, %v1522_v43 }
 0x7c7   :  { %v1496_v42 = vpop.permute.xlu1 %1495 }
 0x7c8   :  { %v1513_v0 = vmul.f32 %v1496_v42, %v2560_v8 }
 0x7ca   :  { %v1525_v36 = vsel %vm401_vm1, %v1513_v0, 0.0 }
 0x7cb   :  { %v1526_v44 = vadd.f32 %v1525_v36, %v1524_v32 }
 0x7cd   :  { %v1528_v49 = vadd.f32 %v1527_v46, %v1526_v44 }
 0x7cf   :  { %v1530_v50 = vadd.f32 %v1529_v47, %v1528_v49 }
 0x7d1   :  { %1655 = vmatmul.msk.f32.vlgmr.msra.gmra.mxu2 %vm401_vm1, %v1530_v50 }
 0x854   :  { %v1561_v59 = vpop.f32.mrf.mxu2 }
 0x855   :  { %v1562_v13 = vadd.f32 %v1691_v1, %v1561_v59 }
 0x857   :  { %1564 = vst [vmem:[%s2618_s3] sm:$0xff] %v1562_v13 }
 0x858   :  { %1569 = vsyncpa [#allocation3], 1 }
 0x859   :  { %1570 = vsyncpa [#allocation5], 1 }

</bundles_post_ra>
